<compile_context>
chip_gen: v6e
topology: v6e:2x2x1
jax: 0.10.0
libtpu: 0.0.40
codegen_flags: <defaults>
</compile_context>

<pallas_src>
import functools

import jax
import jax.numpy as jnp
from jax import lax
from jax.experimental import pallas as pl
from jax.experimental.pallas import tpu as pltpu


# Problem configuration (fixed at trace time).
N_BATCH, C_IN, C_OUT = 2, 4, 4
BASE = 8
H = W = 16
H2, W2 = H // 2, W // 2
M1 = N_BATCH * H * W          # 512: full-res flattened (n, h, w) lane axis
M2 = N_BATCH * H2 * W2        # 128: half-res flattened (n, h, w) lane axis

# Packed-weight layout: each block starts on a 16-row boundary (bf16 tile
# aligned); columns padded to 144 (= 9 * 16, the largest contraction dim).
_W_ROWS, _W_COLS = 112, 144
_B_ROWS = 64


# ----------------------------------------------------------------------------
# The single fused UNet + MSE kernel
# ----------------------------------------------------------------------------
def _unet_mse_kernel(xslab_ref, gt_ref, w_ref, b_ref, dsel_ref, usel_ref,
                     m_ref, loss_ref, e1tap_ref, ftap_ref, htap_ref, *, inv_n):
    f32, bf16 = jnp.float32, jnp.bfloat16

    masks_full = m_ref[:, 0:M1]          # (9, 512) f32, host-precomputed
    masks_half = m_ref[:, M1:M1 + M2]    # (9, 128) f32

    def build_taps(act, masks, w_size, m, cin, out_ref):
        """Pack the 9 shifted + boundary-masked taps of act (cin, m) into
        out_ref rows [0, 9*cin): in-register im2col via lane rolls.  Rolls
        wrap across image/batch boundaries but every such lane is zeroed by
        the host-precomputed mask."""
        for di in range(3):
            for dj in range(3):
                t = di * 3 + dj
                oi, oj = di - 1, dj - 1
                delta = oi * w_size + oj
                if delta == 0:
                    tap = act                                   # centre tap
                else:
                    tap = pltpu.roll(act, shift=(-delta) % m, axis=1)
                    tap = tap * masks[t:t + 1, :]
                out_ref[t * cin:(t + 1) * cin, :] = tap

    # ---- encoder conv1: im2col slab of x is host-built (bf16) --------------
    e1 = jnp.dot(w_ref[0:8, 0:36], xslab_ref[...],
                 preferred_element_type=f32) + b_ref[0:8, :]
    e1 = jnp.maximum(e1, 0.0)                                   # (8, 512) f32

    # e1 tap slab: built once, reused by 'down' conv AND the decoder skip.
    build_taps(e1, masks_full, W, M1, BASE, e1tap_ref)
    e1_slab = e1tap_ref[...].astype(bf16)                       # (72, 512)

    # ---- stride-2 'down' conv = full-res conv + 0/1 selection matmul -------
    dn_acc = jnp.dot(w_ref[16:32, 0:72], e1_slab,
                     preferred_element_type=f32)                # (16, 512)
    dn = jnp.dot(dn_acc.astype(bf16), dsel_ref[...],
                 preferred_element_type=f32) + b_ref[8:24, :]   # (16, 128)
    dn = jnp.maximum(dn, 0.0)

    # ---- bottleneck at half resolution --------------------------------------
    build_taps(dn, masks_half, W2, M2, 2 * BASE, htap_ref)
    bt = jnp.dot(w_ref[64:80, 0:144], htap_ref[...].astype(bf16),
                 preferred_element_type=f32) + b_ref[24:40, :]
    bt = jnp.maximum(bt, 0.0)                                   # (16, 128)

    # ---- nearest x2 upsample (0/1 selection matmul) + 'up' conv ------------
    u_in = jnp.dot(bt.astype(bf16), usel_ref[...],
                   preferred_element_type=f32)                  # (16, 512)
    build_taps(u_in, masks_full, W, M1, 2 * BASE, ftap_ref)
    up = jnp.dot(w_ref[80:88, 0:144], ftap_ref[...].astype(bf16),
                 preferred_element_type=f32) + b_ref[40:48, :]
    up = jnp.maximum(up, 0.0)                                   # (8, 512)

    # ---- decoder conv over concat([up, e1]): two accumulated matmuls -------
    build_taps(up, masks_full, W, M1, BASE, ftap_ref)           # rows 0:72
    dc = (jnp.dot(w_ref[32:40, 0:72], ftap_ref[0:72, :].astype(bf16),
                  preferred_element_type=f32)
          + jnp.dot(w_ref[48:56, 0:72], e1_slab,
                    preferred_element_type=f32)
          + b_ref[48:56, :])
    dc = jnp.maximum(dc, 0.0)                                   # (8, 512)

    # ---- 1x1 output conv (no activation) + fused MSE epilogue --------------
    out = jnp.dot(w_ref[96:100, 0:8], dc.astype(bf16),
                  preferred_element_type=f32) + b_ref[56:60, :]  # (4, 512)
    d = out - gt_ref[...]
    s = jnp.sum(d * d, axis=1, keepdims=True)                   # (4, 1)
    s = jnp.sum(s, axis=0, keepdims=True)                       # (1, 1)
    loss_ref[...] = s * inv_n


# ----------------------------------------------------------------------------
# Parameters
# ----------------------------------------------------------------------------
def init_params(key, c_in=C_IN, base=BASE, c_out=C_OUT):
    """Conv weights stored per-tap: (taps, Cout, Cin); biases as (Cout, 1)."""
    def conv_w(k, taps, cout, cin):
        scale = 1.0 / float(taps * cin) ** 0.5
        return jax.random.normal(k, (taps, cout, cin), jnp.float32) * scale

    def bias(k, cout):
        return jax.random.normal(k, (cout, 1), jnp.float32) * 0.1

    ks = jax.random.split(key, 13)
    return {
        "enc1": (conv_w(ks[0], 9, base, c_in), bias(ks[1], base)),
        "down": (conv_w(ks[2], 9, 2 * base, base), bias(ks[3], 2 * base)),
        "bott": (conv_w(ks[4], 9, 2 * base, 2 * base), bias(ks[5], 2 * base)),
        "up":   (conv_w(ks[6], 9, base, 2 * base), bias(ks[7], base)),
        "dec_u": conv_w(ks[8], 9, base, base),
        "dec_e": conv_w(ks[9], 9, base, base),
        "dec_b": bias(ks[10], base),
        "out":  (conv_w(ks[11], 1, c_out, base), bias(ks[12], c_out)),
    }


# ----------------------------------------------------------------------------
# Host-side constant / packing helpers (outside the Pallas kernel)
# ----------------------------------------------------------------------------
def _to_cm(a_nchw):
    """NCHW -> (C, N*H*W); flat lane index = n*H*W + h*W + w."""
    n, c, h, w = a_nchw.shape
    return jnp.transpose(a_nchw, (1, 0, 2, 3)).reshape(c, n * h * w)


def _im2col_input(x_nchw):
    """Host im2col of the network input: (9*C_IN, N*H*W), rows = t*C_IN + c."""
    n, c, h, w = x_nchw.shape
    xp = jnp.pad(x_nchw, ((0, 0), (0, 0), (1, 1), (1, 1)))
    taps = []
    for di in range(3):
        for dj in range(3):
            shifted = xp[:, :, di:di + h, dj:dj + w]            # (N, C, H, W)
            taps.append(jnp.transpose(shifted, (1, 0, 2, 3)).reshape(c, n * h * w))
    return jnp.concatenate(taps, axis=0)


def _flatten_w(w_taps):
    """(9, Cout, Cin) -> (Cout, 9*Cin); column index = t*Cin + ci."""
    t, co, ci = w_taps.shape
    return jnp.transpose(w_taps, (1, 0, 2)).reshape(co, t * ci)


def _pack_weights(params):
    wbuf = jnp.zeros((_W_ROWS, _W_COLS), jnp.float32)

    def put(buf, r0, wflat):
        return buf.at[r0:r0 + wflat.shape[0], 0:wflat.shape[1]].set(wflat)

    wbuf = put(wbuf, 0,  _flatten_w(params["enc1"][0]))   # (8, 36)
    wbuf = put(wbuf, 16, _flatten_w(params["down"][0]))   # (16, 72)
    wbuf = put(wbuf, 32, _flatten_w(params["dec_u"]))     # (8, 72)
    wbuf = put(wbuf, 48, _flatten_w(params["dec_e"]))     # (8, 72)
    wbuf = put(wbuf, 64, _flatten_w(params["bott"][0]))   # (16, 144)
    wbuf = put(wbuf, 80, _flatten_w(params["up"][0]))     # (8, 144)
    wbuf = put(wbuf, 96, params["out"][0][0])             # (4, 8)
    return wbuf.astype(jnp.bfloat16)


def _pack_biases(params):
    bbuf = jnp.zeros((_B_ROWS, 1), jnp.float32)
    bbuf = bbuf.at[0:8].set(params["enc1"][1])
    bbuf = bbuf.at[8:24].set(params["down"][1])
    bbuf = bbuf.at[24:40].set(params["bott"][1])
    bbuf = bbuf.at[40:48].set(params["up"][1])
    bbuf = bbuf.at[48:56].set(params["dec_b"])
    bbuf = bbuf.at[56:60].set(params["out"][1])
    return bbuf


def _tap_masks_host(h, w, n):
    """(9, n*h*w) f32 0/1 boundary-validity masks, one row per 3x3 tap."""
    m = n * h * w
    idx = jnp.arange(m)
    hc = (idx // w) % h
    wc = idx % w
    rows = []
    for di in range(3):
        for dj in range(3):
            oi, oj = di - 1, dj - 1
            valid = ((hc + oi >= 0) & (hc + oi < h) &
                     (wc + oj >= 0) & (wc + oj < w))
            rows.append(valid.astype(jnp.float32))
    return jnp.stack(rows, axis=0)


def _downsample_sel():
    """(M1, M2) bf16 0/1: out[:, q] selects full-res lane (n, 2*ho, 2*wo)."""
    q = jnp.arange(M2)
    n_o = q // (H2 * W2)
    rem = q % (H2 * W2)
    h_o = rem // W2
    w_o = rem % W2
    src = n_o * (H * W) + (2 * h_o) * W + 2 * w_o
    return (jnp.arange(M1)[:, None] == src[None, :]).astype(jnp.bfloat16)


def _upsample_sel():
    """(M2, M1) bf16 0/1 nearest-x2: out[:, q] selects half-res lane (n, h//2, w//2)."""
    q = jnp.arange(M1)
    n_o = q // (H * W)
    rem = q % (H * W)
    h_o = rem // W
    w_o = rem % W
    src = n_o * (H2 * W2) + (h_o // 2) * W2 + (w_o // 2)
    return (jnp.arange(M2)[:, None] == src[None, :]).astype(jnp.bfloat16)


# ----------------------------------------------------------------------------
# Wrapper: MyEnsembleParallel.forward = loss(unet(x), gt), one fused kernel
# ----------------------------------------------------------------------------
def ensemble_forward(params, x_nchw, gt_nchw):
    x_slab = _im2col_input(x_nchw).astype(jnp.bfloat16)         # (36, 512)
    gt_cm = _to_cm(gt_nchw).astype(jnp.float32)                 # (4, 512)
    wbuf = _pack_weights(params)                                # (112, 144) bf16
    bbuf = _pack_biases(params)                                 # (64, 1) f32
    dsel = _downsample_sel()                                    # (512, 128) bf16
    usel = _upsample_sel()                                      # (128, 512) bf16
    masks = jnp.concatenate([_tap_masks_host(H, W, N_BATCH),
                             _tap_masks_host(H2, W2, N_BATCH)], axis=1)  # (9, 640)
    inv_n = 1.0 / float(gt_nchw.size)

    loss = pl.pallas_call(
        functools.partial(_unet_mse_kernel, inv_n=inv_n),
        out_shape=jax.ShapeDtypeStruct((1, 1), jnp.float32),
        scratch_shapes=[
            pltpu.VMEM((9 * BASE, M1), jnp.float32),        # e1 tap slab (72, 512)
            pltpu.VMEM((9 * 2 * BASE, M1), jnp.float32),    # full-res tap slab (144, 512)
            pltpu.VMEM((9 * 2 * BASE, M2), jnp.float32),    # half-res tap slab (144, 128)
        ],
        cost_estimate=pl.CostEstimate(
            flops=9_000_000, transcendentals=0, bytes_accessed=400_000),
    )(x_slab, gt_cm, wbuf, bbuf, dsel, usel, masks)
    return loss[0, 0]


# ----------------------------------------------------------------------------
# Pure-JAX reference (same math: bf16 MXU operands, f32 accumulation)
# ----------------------------------------------------------------------------
def _taps_to_hwio(w_taps):
    t, cout, cin = w_taps.shape
    k = int(round(t ** 0.5))
    return jnp.transpose(w_taps.reshape(k, k, cout, cin), (0, 1, 3, 2))


def _conv_ref(x_nhwc, w_taps, b, *, stride=1, pad=1, relu=True):
    w = _taps_to_hwio(w_taps).astype(jnp.bfloat16)
    y = lax.conv_general_dilated(
        x_nhwc.astype(jnp.bfloat16), w,
        window_strides=(stride, stride), padding=[(pad, pad), (pad, pad)],
        dimension_numbers=("NHWC", "HWIO", "NHWC"),
        preferred_element_type=jnp.float32)
    y = y + b.reshape(1, 1, 1, -1)
    return jnp.maximum(y, 0.0) if relu else y


def ensemble_forward_ref(params, x_nchw, gt_nchw):
    x = jnp.transpose(x_nchw, (0, 2, 3, 1))                     # NCHW -> NHWC
    e1 = _conv_ref(x, *params["enc1"])
    dn = _conv_ref(e1, *params["down"], stride=2)
    bt = _conv_ref(dn, *params["bott"])
    u = jnp.repeat(jnp.repeat(bt, 2, axis=1), 2, axis=2)        # nearest x2
    up = _conv_ref(u, *params["up"])
    cat = jnp.concatenate([up, e1], axis=-1)                    # skip concat
    w_dec = jnp.concatenate([params["dec_u"], params["dec_e"]], axis=2)
    dc = _conv_ref(cat, w_dec, params["dec_b"])
    o = _conv_ref(dc, *params["out"], pad=0, relu=False)
    o_nchw = jnp.transpose(o, (0, 3, 1, 2))
    return jnp.mean((o_nchw - gt_nchw) ** 2)


# ----------------------------------------------------------------------------
if __name__ == "__main__":
    key = jax.random.PRNGKey(0)
    kx, kgt, kp = jax.random.split(key, 3)
    x = jax.random.normal(kx, (N_BATCH, C_IN, H, W), jnp.float32)     # NCHW
    gt = jax.random.normal(kgt, (N_BATCH, C_OUT, H, W), jnp.float32)  # NCHW
    params = init_params(kp)

    loss = jax.jit(ensemble_forward)(params, x, gt)
    jax.block_until_ready(loss)

    loss_ref = jax.jit(ensemble_forward_ref)(params, x, gt)
    assert jnp.allclose(loss, loss_ref, rtol=1e-2, atol=1e-3), (loss, loss_ref)

    print("KERNEL_OK")
</pallas_src>

<mosaic_0001>
module attributes {stable_mosaic.version = 11 : i64} {
  func.func @_unet_mse_kernel(%arg0: memref<36x512xbf16, #tpu.memory_space<vmem>>, %arg1: memref<4x512xf32, #tpu.memory_space<vmem>>, %arg2: memref<112x144xbf16, #tpu.memory_space<vmem>>, %arg3: memref<64x1xf32, #tpu.memory_space<vmem>>, %arg4: memref<512x128xbf16, #tpu.memory_space<vmem>>, %arg5: memref<128x512xbf16, #tpu.memory_space<vmem>>, %arg6: memref<9x640xf32, #tpu.memory_space<vmem>>, %arg7: memref<1x1xf32, #tpu.memory_space<vmem>>, %arg8: memref<72x512xf32, #tpu.memory_space<vmem>>, %arg9: memref<144x512xf32, #tpu.memory_space<vmem>>, %arg10: memref<144x128xf32, #tpu.memory_space<vmem>>) attributes {dimension_semantics = [], scalar_prefetch = 0 : i64, scratch_operands = 3 : i64, tpu.core_type = #tpu.core_type<tc>} {
    %c0 = arith.constant 0 : index
    %c0_0 = arith.constant 0 : index
    %0 = vector.load %arg6[%c0, %c0_0] : memref<9x640xf32, #tpu.memory_space<vmem>>, vector<9x512xf32>
    %c0_1 = arith.constant 0 : index
    %c512 = arith.constant 512 : index
    %1 = vector.load %arg6[%c0_1, %c512] : memref<9x640xf32, #tpu.memory_space<vmem>>, vector<9x128xf32>
    %c0_2 = arith.constant 0 : index
    %c0_3 = arith.constant 0 : index
    %2 = vector.load %arg2[%c0_2, %c0_3] : memref<112x144xbf16, #tpu.memory_space<vmem>>, vector<8x36xbf16>
    %c0_4 = arith.constant 0 : index
    %c0_5 = arith.constant 0 : index
    %3 = vector.load %arg0[%c0_4, %c0_5] : memref<36x512xbf16, #tpu.memory_space<vmem>>, vector<36x512xbf16>
    %cst = arith.constant dense<0.000000e+00> : vector<8x512xf32>
    %4 = tpu.matmul %2, %3, %cst {dimension_numbers = #tpu.dot_dimension_numbers<[1], [0], [0], [1], [0, 0, 1, 1], [], []>} : vector<8x36xbf16>, vector<36x512xbf16>, vector<8x512xf32> -> vector<8x512xf32>
    %c0_6 = arith.constant 0 : index
    %c0_7 = arith.constant 0 : index
    %5 = vector.load %arg3[%c0_6, %c0_7] : memref<64x1xf32, #tpu.memory_space<vmem>>, vector<8x1xf32>
    %6 = vector.broadcast %5 : vector<8x1xf32> to vector<8x512xf32>
    %7 = arith.addf %4, %6 : vector<8x512xf32>
    %cst_8 = arith.constant 0.000000e+00 : f32
    %8 = vector.broadcast %cst_8 : f32 to vector<8x512xf32>
    %9 = arith.maximumf %7, %8 : vector<8x512xf32>
    %c17_i32 = arith.constant 17 : i32
    %10 = tpu.dynamic_rotate %9 by %c17_i32 dim 1 : vector<8x512xf32>, i32 -> vector<8x512xf32>
    %11 = vector.extract_strided_slice %0 {offsets = [0, 0], sizes = [1, 512], strides = [1, 1]} : vector<9x512xf32> to vector<1x512xf32>
    %12 = vector.broadcast %11 : vector<1x512xf32> to vector<8x512xf32>
    %13 = arith.mulf %10, %12 : vector<8x512xf32>
    %c0_9 = arith.constant 0 : index
    %c0_10 = arith.constant 0 : index
    %14 = vector.load %arg8[%c0_9, %c0_10] : memref<72x512xf32, #tpu.memory_space<vmem>>, vector<8x512xf32>
    tpu.vector_store %arg8[%c0_9, %c0_10], %13 {strides = array<i32>} : memref<72x512xf32, #tpu.memory_space<vmem>>, vector<8x512xf32>,
    %c16_i32 = arith.constant 16 : i32
    %15 = tpu.dynamic_rotate %9 by %c16_i32 dim 1 : vector<8x512xf32>, i32 -> vector<8x512xf32>
    %16 = vector.extract_strided_slice %0 {offsets = [1, 0], sizes = [1, 512], strides = [1, 1]} : vector<9x512xf32> to vector<1x512xf32>
    %17 = vector.broadcast %16 : vector<1x512xf32> to vector<8x512xf32>
    %18 = arith.mulf %15, %17 : vector<8x512xf32>
    %c8 = arith.constant 8 : index
    %c0_11 = arith.constant 0 : index
    %19 = vector.load %arg8[%c8, %c0_11] : memref<72x512xf32, #tpu.memory_space<vmem>>, vector<8x512xf32>
    tpu.vector_store %arg8[%c8, %c0_11], %18 {strides = array<i32>} : memref<72x512xf32, #tpu.memory_space<vmem>>, vector<8x512xf32>,
    %c15_i32 = arith.constant 15 : i32
    %20 = tpu.dynamic_rotate %9 by %c15_i32 dim 1 : vector<8x512xf32>, i32 -> vector<8x512xf32>
    %21 = vector.extract_strided_slice %0 {offsets = [2, 0], sizes = [1, 512], strides = [1, 1]} : vector<9x512xf32> to vector<1x512xf32>
    %22 = vector.broadcast %21 : vector<1x512xf32> to vector<8x512xf32>
    %23 = arith.mulf %20, %22 : vector<8x512xf32>
    %c16 = arith.constant 16 : index
    %c0_12 = arith.constant 0 : index
    %24 = vector.load %arg8[%c16, %c0_12] : memref<72x512xf32, #tpu.memory_space<vmem>>, vector<8x512xf32>
    tpu.vector_store %arg8[%c16, %c0_12], %23 {strides = array<i32>} : memref<72x512xf32, #tpu.memory_space<vmem>>, vector<8x512xf32>,
    %c1_i32 = arith.constant 1 : i32
    %25 = tpu.dynamic_rotate %9 by %c1_i32 dim 1 : vector<8x512xf32>, i32 -> vector<8x512xf32>
    %26 = vector.extract_strided_slice %0 {offsets = [3, 0], sizes = [1, 512], strides = [1, 1]} : vector<9x512xf32> to vector<1x512xf32>
    %27 = vector.broadcast %26 : vector<1x512xf32> to vector<8x512xf32>
    %28 = arith.mulf %25, %27 : vector<8x512xf32>
    %c24 = arith.constant 24 : index
    %c0_13 = arith.constant 0 : index
    %29 = vector.load %arg8[%c24, %c0_13] : memref<72x512xf32, #tpu.memory_space<vmem>>, vector<8x512xf32>
    tpu.vector_store %arg8[%c24, %c0_13], %28 {strides = array<i32>} : memref<72x512xf32, #tpu.memory_space<vmem>>, vector<8x512xf32>,
    %c32 = arith.constant 32 : index
    %c0_14 = arith.constant 0 : index
    %30 = vector.load %arg8[%c32, %c0_14] : memref<72x512xf32, #tpu.memory_space<vmem>>, vector<8x512xf32>
    tpu.vector_store %arg8[%c32, %c0_14], %9 {strides = array<i32>} : memref<72x512xf32, #tpu.memory_space<vmem>>, vector<8x512xf32>,
    %c511_i32 = arith.constant 511 : i32
    %31 = tpu.dynamic_rotate %9 by %c511_i32 dim 1 : vector<8x512xf32>, i32 -> vector<8x512xf32>
    %32 = vector.extract_strided_slice %0 {offsets = [5, 0], sizes = [1, 512], strides = [1, 1]} : vector<9x512xf32> to vector<1x512xf32>
    %33 = vector.broadcast %32 : vector<1x512xf32> to vector<8x512xf32>
    %34 = arith.mulf %31, %33 : vector<8x512xf32>
    %c40 = arith.constant 40 : index
    %c0_15 = arith.constant 0 : index
    %35 = vector.load %arg8[%c40, %c0_15] : memref<72x512xf32, #tpu.memory_space<vmem>>, vector<8x512xf32>
    tpu.vector_store %arg8[%c40, %c0_15], %34 {strides = array<i32>} : memref<72x512xf32, #tpu.memory_space<vmem>>, vector<8x512xf32>,
    %c497_i32 = arith.constant 497 : i32
    %36 = tpu.dynamic_rotate %9 by %c497_i32 dim 1 : vector<8x512xf32>, i32 -> vector<8x512xf32>
    %37 = vector.extract_strided_slice %0 {offsets = [6, 0], sizes = [1, 512], strides = [1, 1]} : vector<9x512xf32> to vector<1x512xf32>
    %38 = vector.broadcast %37 : vector<1x512xf32> to vector<8x512xf32>
    %39 = arith.mulf %36, %38 : vector<8x512xf32>
    %c48 = arith.constant 48 : index
    %c0_16 = arith.constant 0 : index
    %40 = vector.load %arg8[%c48, %c0_16] : memref<72x512xf32, #tpu.memory_space<vmem>>, vector<8x512xf32>
    tpu.vector_store %arg8[%c48, %c0_16], %39 {strides = array<i32>} : memref<72x512xf32, #tpu.memory_space<vmem>>, vector<8x512xf32>,
    %c496_i32 = arith.constant 496 : i32
    %41 = tpu.dynamic_rotate %9 by %c496_i32 dim 1 : vector<8x512xf32>, i32 -> vector<8x512xf32>
    %42 = vector.extract_strided_slice %0 {offsets = [7, 0], sizes = [1, 512], strides = [1, 1]} : vector<9x512xf32> to vector<1x512xf32>
    %43 = vector.broadcast %42 : vector<1x512xf32> to vector<8x512xf32>
    %44 = arith.mulf %41, %43 : vector<8x512xf32>
    %c56 = arith.constant 56 : index
    %c0_17 = arith.constant 0 : index
    %45 = vector.load %arg8[%c56, %c0_17] : memref<72x512xf32, #tpu.memory_space<vmem>>, vector<8x512xf32>
    tpu.vector_store %arg8[%c56, %c0_17], %44 {strides = array<i32>} : memref<72x512xf32, #tpu.memory_space<vmem>>, vector<8x512xf32>,
    %c495_i32 = arith.constant 495 : i32
    %46 = tpu.dynamic_rotate %9 by %c495_i32 dim 1 : vector<8x512xf32>, i32 -> vector<8x512xf32>
    %47 = vector.extract_strided_slice %0 {offsets = [8, 0], sizes = [1, 512], strides = [1, 1]} : vector<9x512xf32> to vector<1x512xf32>
    %48 = vector.broadcast %47 : vector<1x512xf32> to vector<8x512xf32>
    %49 = arith.mulf %46, %48 : vector<8x512xf32>
    %c64 = arith.constant 64 : index
    %c0_18 = arith.constant 0 : index
    %50 = vector.load %arg8[%c64, %c0_18] : memref<72x512xf32, #tpu.memory_space<vmem>>, vector<8x512xf32>
    tpu.vector_store %arg8[%c64, %c0_18], %49 {strides = array<i32>} : memref<72x512xf32, #tpu.memory_space<vmem>>, vector<8x512xf32>,
    %c0_19 = arith.constant 0 : index
    %c0_20 = arith.constant 0 : index
    %51 = vector.load %arg8[%c0_19, %c0_20] : memref<72x512xf32, #tpu.memory_space<vmem>>, vector<72x512xf32>
    %52 = arith.truncf %51 : vector<72x512xf32> to vector<72x512xbf16>
    %c16_21 = arith.constant 16 : index
    %c0_22 = arith.constant 0 : index
    %53 = vector.load %arg2[%c16_21, %c0_22] : memref<112x144xbf16, #tpu.memory_space<vmem>>, vector<16x72xbf16>
    %cst_23 = arith.constant dense<0.000000e+00> : vector<16x512xf32>
    %54 = tpu.matmul %53, %52, %cst_23 {dimension_numbers = #tpu.dot_dimension_numbers<[1], [0], [0], [1], [0, 0, 1, 1], [], []>} : vector<16x72xbf16>, vector<72x512xbf16>, vector<16x512xf32> -> vector<16x512xf32>
    %55 = arith.truncf %54 : vector<16x512xf32> to vector<16x512xbf16>
    %c0_24 = arith.constant 0 : index
    %c0_25 = arith.constant 0 : index
    %56 = vector.load %arg4[%c0_24, %c0_25] : memref<512x128xbf16, #tpu.memory_space<vmem>>, vector<512x128xbf16>
    %cst_26 = arith.constant dense<0.000000e+00> : vector<16x128xf32>
    %57 = tpu.matmul %55, %56, %cst_26 {dimension_numbers = #tpu.dot_dimension_numbers<[1], [0], [0], [1], [0, 0, 1, 1], [], []>} : vector<16x512xbf16>, vector<512x128xbf16>, vector<16x128xf32> -> vector<16x128xf32>
    %c8_27 = arith.constant 8 : index
    %c0_28 = arith.constant 0 : index
    %58 = vector.load %arg3[%c8_27, %c0_28] : memref<64x1xf32, #tpu.memory_space<vmem>>, vector<16x1xf32>
    %59 = vector.broadcast %58 : vector<16x1xf32> to vector<16x128xf32>
    %60 = arith.addf %57, %59 : vector<16x128xf32>
    %cst_29 = arith.constant 0.000000e+00 : f32
    %61 = vector.broadcast %cst_29 : f32 to vector<16x128xf32>
    %62 = arith.maximumf %60, %61 : vector<16x128xf32>
    %c9_i32 = arith.constant 9 : i32
    %63 = tpu.dynamic_rotate %62 by %c9_i32 dim 1 : vector<16x128xf32>, i32 -> vector<16x128xf32>
    %64 = vector.extract_strided_slice %1 {offsets = [0, 0], sizes = [1, 128], strides = [1, 1]} : vector<9x128xf32> to vector<1x128xf32>
    %65 = vector.broadcast %64 : vector<1x128xf32> to vector<16x128xf32>
    %66 = arith.mulf %63, %65 : vector<16x128xf32>
    %c0_30 = arith.constant 0 : index
    %c0_31 = arith.constant 0 : index
    %67 = vector.load %arg10[%c0_30, %c0_31] : memref<144x128xf32, #tpu.memory_space<vmem>>, vector<16x128xf32>
    tpu.vector_store %arg10[%c0_30, %c0_31], %66 {strides = array<i32>} : memref<144x128xf32, #tpu.memory_space<vmem>>, vector<16x128xf32>,
    %c8_i32 = arith.constant 8 : i32
    %68 = tpu.dynamic_rotate %62 by %c8_i32 dim 1 : vector<16x128xf32>, i32 -> vector<16x128xf32>
    %69 = vector.extract_strided_slice %1 {offsets = [1, 0], sizes = [1, 128], strides = [1, 1]} : vector<9x128xf32> to vector<1x128xf32>
    %70 = vector.broadcast %69 : vector<1x128xf32> to vector<16x128xf32>
    %71 = arith.mulf %68, %70 : vector<16x128xf32>
    %c16_32 = arith.constant 16 : index
    %c0_33 = arith.constant 0 : index
    %72 = vector.load %arg10[%c16_32, %c0_33] : memref<144x128xf32, #tpu.memory_space<vmem>>, vector<16x128xf32>
    tpu.vector_store %arg10[%c16_32, %c0_33], %71 {strides = array<i32>} : memref<144x128xf32, #tpu.memory_space<vmem>>, vector<16x128xf32>,
    %c7_i32 = arith.constant 7 : i32
    %73 = tpu.dynamic_rotate %62 by %c7_i32 dim 1 : vector<16x128xf32>, i32 -> vector<16x128xf32>
    %74 = vector.extract_strided_slice %1 {offsets = [2, 0], sizes = [1, 128], strides = [1, 1]} : vector<9x128xf32> to vector<1x128xf32>
    %75 = vector.broadcast %74 : vector<1x128xf32> to vector<16x128xf32>
    %76 = arith.mulf %73, %75 : vector<16x128xf32>
    %c32_34 = arith.constant 32 : index
    %c0_35 = arith.constant 0 : index
    %77 = vector.load %arg10[%c32_34, %c0_35] : memref<144x128xf32, #tpu.memory_space<vmem>>, vector<16x128xf32>
    tpu.vector_store %arg10[%c32_34, %c0_35], %76 {strides = array<i32>} : memref<144x128xf32, #tpu.memory_space<vmem>>, vector<16x128xf32>,
    %c1_i32_36 = arith.constant 1 : i32
    %78 = tpu.dynamic_rotate %62 by %c1_i32_36 dim 1 : vector<16x128xf32>, i32 -> vector<16x128xf32>
    %79 = vector.extract_strided_slice %1 {offsets = [3, 0], sizes = [1, 128], strides = [1, 1]} : vector<9x128xf32> to vector<1x128xf32>
    %80 = vector.broadcast %79 : vector<1x128xf32> to vector<16x128xf32>
    %81 = arith.mulf %78, %80 : vector<16x128xf32>
    %c48_37 = arith.constant 48 : index
    %c0_38 = arith.constant 0 : index
    %82 = vector.load %arg10[%c48_37, %c0_38] : memref<144x128xf32, #tpu.memory_space<vmem>>, vector<16x128xf32>
    tpu.vector_store %arg10[%c48_37, %c0_38], %81 {strides = array<i32>} : memref<144x128xf32, #tpu.memory_space<vmem>>, vector<16x128xf32>,
    %c64_39 = arith.constant 64 : index
    %c0_40 = arith.constant 0 : index
    %83 = vector.load %arg10[%c64_39, %c0_40] : memref<144x128xf32, #tpu.memory_space<vmem>>, vector<16x128xf32>
    tpu.vector_store %arg10[%c64_39, %c0_40], %62 {strides = array<i32>} : memref<144x128xf32, #tpu.memory_space<vmem>>, vector<16x128xf32>,
    %c127_i32 = arith.constant 127 : i32
    %84 = tpu.dynamic_rotate %62 by %c127_i32 dim 1 : vector<16x128xf32>, i32 -> vector<16x128xf32>
    %85 = vector.extract_strided_slice %1 {offsets = [5, 0], sizes = [1, 128], strides = [1, 1]} : vector<9x128xf32> to vector<1x128xf32>
    %86 = vector.broadcast %85 : vector<1x128xf32> to vector<16x128xf32>
    %87 = arith.mulf %84, %86 : vector<16x128xf32>
    %c80 = arith.constant 80 : index
    %c0_41 = arith.constant 0 : index
    %88 = vector.load %arg10[%c80, %c0_41] : memref<144x128xf32, #tpu.memory_space<vmem>>, vector<16x128xf32>
    tpu.vector_store %arg10[%c80, %c0_41], %87 {strides = array<i32>} : memref<144x128xf32, #tpu.memory_space<vmem>>, vector<16x128xf32>,
    %c121_i32 = arith.constant 121 : i32
    %89 = tpu.dynamic_rotate %62 by %c121_i32 dim 1 : vector<16x128xf32>, i32 -> vector<16x128xf32>
    %90 = vector.extract_strided_slice %1 {offsets = [6, 0], sizes = [1, 128], strides = [1, 1]} : vector<9x128xf32> to vector<1x128xf32>
    %91 = vector.broadcast %90 : vector<1x128xf32> to vector<16x128xf32>
    %92 = arith.mulf %89, %91 : vector<16x128xf32>
    %c96 = arith.constant 96 : index
    %c0_42 = arith.constant 0 : index
    %93 = vector.load %arg10[%c96, %c0_42] : memref<144x128xf32, #tpu.memory_space<vmem>>, vector<16x128xf32>
    tpu.vector_store %arg10[%c96, %c0_42], %92 {strides = array<i32>} : memref<144x128xf32, #tpu.memory_space<vmem>>, vector<16x128xf32>,
    %c120_i32 = arith.constant 120 : i32
    %94 = tpu.dynamic_rotate %62 by %c120_i32 dim 1 : vector<16x128xf32>, i32 -> vector<16x128xf32>
    %95 = vector.extract_strided_slice %1 {offsets = [7, 0], sizes = [1, 128], strides = [1, 1]} : vector<9x128xf32> to vector<1x128xf32>
    %96 = vector.broadcast %95 : vector<1x128xf32> to vector<16x128xf32>
    %97 = arith.mulf %94, %96 : vector<16x128xf32>
    %c112 = arith.constant 112 : index
    %c0_43 = arith.constant 0 : index
    %98 = vector.load %arg10[%c112, %c0_43] : memref<144x128xf32, #tpu.memory_space<vmem>>, vector<16x128xf32>
    tpu.vector_store %arg10[%c112, %c0_43], %97 {strides = array<i32>} : memref<144x128xf32, #tpu.memory_space<vmem>>, vector<16x128xf32>,
    %c119_i32 = arith.constant 119 : i32
    %99 = tpu.dynamic_rotate %62 by %c119_i32 dim 1 : vector<16x128xf32>, i32 -> vector<16x128xf32>
    %100 = vector.extract_strided_slice %1 {offsets = [8, 0], sizes = [1, 128], strides = [1, 1]} : vector<9x128xf32> to vector<1x128xf32>
    %101 = vector.broadcast %100 : vector<1x128xf32> to vector<16x128xf32>
    %102 = arith.mulf %99, %101 : vector<16x128xf32>
    %c128 = arith.constant 128 : index
    %c0_44 = arith.constant 0 : index
    %103 = vector.load %arg10[%c128, %c0_44] : memref<144x128xf32, #tpu.memory_space<vmem>>, vector<16x128xf32>
    tpu.vector_store %arg10[%c128, %c0_44], %102 {strides = array<i32>} : memref<144x128xf32, #tpu.memory_space<vmem>>, vector<16x128xf32>,
    %c64_45 = arith.constant 64 : index
    %c0_46 = arith.constant 0 : index
    %104 = vector.load %arg2[%c64_45, %c0_46] : memref<112x144xbf16, #tpu.memory_space<vmem>>, vector<16x144xbf16>
    %c0_47 = arith.constant 0 : index
    %c0_48 = arith.constant 0 : index
    %105 = vector.load %arg10[%c0_47, %c0_48] : memref<144x128xf32, #tpu.memory_space<vmem>>, vector<144x128xf32>
    %106 = arith.truncf %105 : vector<144x128xf32> to vector<144x128xbf16>
    %cst_49 = arith.constant dense<0.000000e+00> : vector<16x128xf32>
    %107 = tpu.matmul %104, %106, %cst_49 {dimension_numbers = #tpu.dot_dimension_numbers<[1], [0], [0], [1], [0, 0, 1, 1], [], []>} : vector<16x144xbf16>, vector<144x128xbf16>, vector<16x128xf32> -> vector<16x128xf32>
    %c24_50 = arith.constant 24 : index
    %c0_51 = arith.constant 0 : index
    %108 = vector.load %arg3[%c24_50, %c0_51] : memref<64x1xf32, #tpu.memory_space<vmem>>, vector<16x1xf32>
    %109 = vector.broadcast %108 : vector<16x1xf32> to vector<16x128xf32>
    %110 = arith.addf %107, %109 : vector<16x128xf32>
    %cst_52 = arith.constant 0.000000e+00 : f32
    %111 = vector.broadcast %cst_52 : f32 to vector<16x128xf32>
    %112 = arith.maximumf %110, %111 : vector<16x128xf32>
    %113 = arith.truncf %112 : vector<16x128xf32> to vector<16x128xbf16>
    %c0_53 = arith.constant 0 : index
    %c0_54 = arith.constant 0 : index
    %114 = vector.load %arg5[%c0_53, %c0_54] : memref<128x512xbf16, #tpu.memory_space<vmem>>, vector<128x512xbf16>
    %cst_55 = arith.constant dense<0.000000e+00> : vector<16x512xf32>
    %115 = tpu.matmul %113, %114, %cst_55 {dimension_numbers = #tpu.dot_dimension_numbers<[1], [0], [0], [1], [0, 0, 1, 1], [], []>} : vector<16x128xbf16>, vector<128x512xbf16>, vector<16x512xf32> -> vector<16x512xf32>
    %c17_i32_56 = arith.constant 17 : i32
    %116 = tpu.dynamic_rotate %115 by %c17_i32_56 dim 1 : vector<16x512xf32>, i32 -> vector<16x512xf32>
    %117 = vector.extract_strided_slice %0 {offsets = [0, 0], sizes = [1, 512], strides = [1, 1]} : vector<9x512xf32> to vector<1x512xf32>
    %118 = vector.broadcast %117 : vector<1x512xf32> to vector<16x512xf32>
    %119 = arith.mulf %116, %118 : vector<16x512xf32>
    %c0_57 = arith.constant 0 : index
    %c0_58 = arith.constant 0 : index
    %120 = vector.load %arg9[%c0_57, %c0_58] : memref<144x512xf32, #tpu.memory_space<vmem>>, vector<16x512xf32>
    tpu.vector_store %arg9[%c0_57, %c0_58], %119 {strides = array<i32>} : memref<144x512xf32, #tpu.memory_space<vmem>>, vector<16x512xf32>,
    %c16_i32_59 = arith.constant 16 : i32
    %121 = tpu.dynamic_rotate %115 by %c16_i32_59 dim 1 : vector<16x512xf32>, i32 -> vector<16x512xf32>
    %122 = vector.extract_strided_slice %0 {offsets = [1, 0], sizes = [1, 512], strides = [1, 1]} : vector<9x512xf32> to vector<1x512xf32>
    %123 = vector.broadcast %122 : vector<1x512xf32> to vector<16x512xf32>
    %124 = arith.mulf %121, %123 : vector<16x512xf32>
    %c16_60 = arith.constant 16 : index
    %c0_61 = arith.constant 0 : index
    %125 = vector.load %arg9[%c16_60, %c0_61] : memref<144x512xf32, #tpu.memory_space<vmem>>, vector<16x512xf32>
    tpu.vector_store %arg9[%c16_60, %c0_61], %124 {strides = array<i32>} : memref<144x512xf32, #tpu.memory_space<vmem>>, vector<16x512xf32>,
    %c15_i32_62 = arith.constant 15 : i32
    %126 = tpu.dynamic_rotate %115 by %c15_i32_62 dim 1 : vector<16x512xf32>, i32 -> vector<16x512xf32>
    %127 = vector.extract_strided_slice %0 {offsets = [2, 0], sizes = [1, 512], strides = [1, 1]} : vector<9x512xf32> to vector<1x512xf32>
    %128 = vector.broadcast %127 : vector<1x512xf32> to vector<16x512xf32>
    %129 = arith.mulf %126, %128 : vector<16x512xf32>
    %c32_63 = arith.constant 32 : index
    %c0_64 = arith.constant 0 : index
    %130 = vector.load %arg9[%c32_63, %c0_64] : memref<144x512xf32, #tpu.memory_space<vmem>>, vector<16x512xf32>
    tpu.vector_store %arg9[%c32_63, %c0_64], %129 {strides = array<i32>} : memref<144x512xf32, #tpu.memory_space<vmem>>, vector<16x512xf32>,
    %c1_i32_65 = arith.constant 1 : i32
    %131 = tpu.dynamic_rotate %115 by %c1_i32_65 dim 1 : vector<16x512xf32>, i32 -> vector<16x512xf32>
    %132 = vector.extract_strided_slice %0 {offsets = [3, 0], sizes = [1, 512], strides = [1, 1]} : vector<9x512xf32> to vector<1x512xf32>
    %133 = vector.broadcast %132 : vector<1x512xf32> to vector<16x512xf32>
    %134 = arith.mulf %131, %133 : vector<16x512xf32>
    %c48_66 = arith.constant 48 : index
    %c0_67 = arith.constant 0 : index
    %135 = vector.load %arg9[%c48_66, %c0_67] : memref<144x512xf32, #tpu.memory_space<vmem>>, vector<16x512xf32>
    tpu.vector_store %arg9[%c48_66, %c0_67], %134 {strides = array<i32>} : memref<144x512xf32, #tpu.memory_space<vmem>>, vector<16x512xf32>,
    %c64_68 = arith.constant 64 : index
    %c0_69 = arith.constant 0 : index
    %136 = vector.load %arg9[%c64_68, %c0_69] : memref<144x512xf32, #tpu.memory_space<vmem>>, vector<16x512xf32>
    tpu.vector_store %arg9[%c64_68, %c0_69], %115 {strides = array<i32>} : memref<144x512xf32, #tpu.memory_space<vmem>>, vector<16x512xf32>,
    %c511_i32_70 = arith.constant 511 : i32
    %137 = tpu.dynamic_rotate %115 by %c511_i32_70 dim 1 : vector<16x512xf32>, i32 -> vector<16x512xf32>
    %138 = vector.extract_strided_slice %0 {offsets = [5, 0], sizes = [1, 512], strides = [1, 1]} : vector<9x512xf32> to vector<1x512xf32>
    %139 = vector.broadcast %138 : vector<1x512xf32> to vector<16x512xf32>
    %140 = arith.mulf %137, %139 : vector<16x512xf32>
    %c80_71 = arith.constant 80 : index
    %c0_72 = arith.constant 0 : index
    %141 = vector.load %arg9[%c80_71, %c0_72] : memref<144x512xf32, #tpu.memory_space<vmem>>, vector<16x512xf32>
    tpu.vector_store %arg9[%c80_71, %c0_72], %140 {strides = array<i32>} : memref<144x512xf32, #tpu.memory_space<vmem>>, vector<16x512xf32>,
    %c497_i32_73 = arith.constant 497 : i32
    %142 = tpu.dynamic_rotate %115 by %c497_i32_73 dim 1 : vector<16x512xf32>, i32 -> vector<16x512xf32>
    %143 = vector.extract_strided_slice %0 {offsets = [6, 0], sizes = [1, 512], strides = [1, 1]} : vector<9x512xf32> to vector<1x512xf32>
    %144 = vector.broadcast %143 : vector<1x512xf32> to vector<16x512xf32>
    %145 = arith.mulf %142, %144 : vector<16x512xf32>
    %c96_74 = arith.constant 96 : index
    %c0_75 = arith.constant 0 : index
    %146 = vector.load %arg9[%c96_74, %c0_75] : memref<144x512xf32, #tpu.memory_space<vmem>>, vector<16x512xf32>
    tpu.vector_store %arg9[%c96_74, %c0_75], %145 {strides = array<i32>} : memref<144x512xf32, #tpu.memory_space<vmem>>, vector<16x512xf32>,
    %c496_i32_76 = arith.constant 496 : i32
    %147 = tpu.dynamic_rotate %115 by %c496_i32_76 dim 1 : vector<16x512xf32>, i32 -> vector<16x512xf32>
    %148 = vector.extract_strided_slice %0 {offsets = [7, 0], sizes = [1, 512], strides = [1, 1]} : vector<9x512xf32> to vector<1x512xf32>
    %149 = vector.broadcast %148 : vector<1x512xf32> to vector<16x512xf32>
    %150 = arith.mulf %147, %149 : vector<16x512xf32>
    %c112_77 = arith.constant 112 : index
    %c0_78 = arith.constant 0 : index
    %151 = vector.load %arg9[%c112_77, %c0_78] : memref<144x512xf32, #tpu.memory_space<vmem>>, vector<16x512xf32>
    tpu.vector_store %arg9[%c112_77, %c0_78], %150 {strides = array<i32>} : memref<144x512xf32, #tpu.memory_space<vmem>>, vector<16x512xf32>,
    %c495_i32_79 = arith.constant 495 : i32
    %152 = tpu.dynamic_rotate %115 by %c495_i32_79 dim 1 : vector<16x512xf32>, i32 -> vector<16x512xf32>
    %153 = vector.extract_strided_slice %0 {offsets = [8, 0], sizes = [1, 512], strides = [1, 1]} : vector<9x512xf32> to vector<1x512xf32>
    %154 = vector.broadcast %153 : vector<1x512xf32> to vector<16x512xf32>
    %155 = arith.mulf %152, %154 : vector<16x512xf32>
    %c128_80 = arith.constant 128 : index
    %c0_81 = arith.constant 0 : index
    %156 = vector.load %arg9[%c128_80, %c0_81] : memref<144x512xf32, #tpu.memory_space<vmem>>, vector<16x512xf32>
    tpu.vector_store %arg9[%c128_80, %c0_81], %155 {strides = array<i32>} : memref<144x512xf32, #tpu.memory_space<vmem>>, vector<16x512xf32>,
    %c80_82 = arith.constant 80 : index
    %c0_83 = arith.constant 0 : index
    %157 = vector.load %arg2[%c80_82, %c0_83] : memref<112x144xbf16, #tpu.memory_space<vmem>>, vector<8x144xbf16>
    %c0_84 = arith.constant 0 : index
    %c0_85 = arith.constant 0 : index
    %158 = vector.load %arg9[%c0_84, %c0_85] : memref<144x512xf32, #tpu.memory_space<vmem>>, vector<144x512xf32>
    %159 = arith.truncf %158 : vector<144x512xf32> to vector<144x512xbf16>
    %cst_86 = arith.constant dense<0.000000e+00> : vector<8x512xf32>
    %160 = tpu.matmul %157, %159, %cst_86 {dimension_numbers = #tpu.dot_dimension_numbers<[1], [0], [0], [1], [0, 0, 1, 1], [], []>} : vector<8x144xbf16>, vector<144x512xbf16>, vector<8x512xf32> -> vector<8x512xf32>
    %c40_87 = arith.constant 40 : index
    %c0_88 = arith.constant 0 : index
    %161 = vector.load %arg3[%c40_87, %c0_88] : memref<64x1xf32, #tpu.memory_space<vmem>>, vector<8x1xf32>
    %162 = vector.broadcast %161 : vector<8x1xf32> to vector<8x512xf32>
    %163 = arith.addf %160, %162 : vector<8x512xf32>
    %cst_89 = arith.constant 0.000000e+00 : f32
    %164 = vector.broadcast %cst_89 : f32 to vector<8x512xf32>
    %165 = arith.maximumf %163, %164 : vector<8x512xf32>
    %c17_i32_90 = arith.constant 17 : i32
    %166 = tpu.dynamic_rotate %165 by %c17_i32_90 dim 1 : vector<8x512xf32>, i32 -> vector<8x512xf32>
    %167 = vector.extract_strided_slice %0 {offsets = [0, 0], sizes = [1, 512], strides = [1, 1]} : vector<9x512xf32> to vector<1x512xf32>
    %168 = vector.broadcast %167 : vector<1x512xf32> to vector<8x512xf32>
    %169 = arith.mulf %166, %168 : vector<8x512xf32>
    %c0_91 = arith.constant 0 : index
    %c0_92 = arith.constant 0 : index
    %170 = vector.load %arg9[%c0_91, %c0_92] : memref<144x512xf32, #tpu.memory_space<vmem>>, vector<8x512xf32>
    tpu.vector_store %arg9[%c0_91, %c0_92], %169 {strides = array<i32>} : memref<144x512xf32, #tpu.memory_space<vmem>>, vector<8x512xf32>,
    %c16_i32_93 = arith.constant 16 : i32
    %171 = tpu.dynamic_rotate %165 by %c16_i32_93 dim 1 : vector<8x512xf32>, i32 -> vector<8x512xf32>
    %172 = vector.extract_strided_slice %0 {offsets = [1, 0], sizes = [1, 512], strides = [1, 1]} : vector<9x512xf32> to vector<1x512xf32>
    %173 = vector.broadcast %172 : vector<1x512xf32> to vector<8x512xf32>
    %174 = arith.mulf %171, %173 : vector<8x512xf32>
    %c8_94 = arith.constant 8 : index
    %c0_95 = arith.constant 0 : index
    %175 = vector.load %arg9[%c8_94, %c0_95] : memref<144x512xf32, #tpu.memory_space<vmem>>, vector<8x512xf32>
    tpu.vector_store %arg9[%c8_94, %c0_95], %174 {strides = array<i32>} : memref<144x512xf32, #tpu.memory_space<vmem>>, vector<8x512xf32>,
    %c15_i32_96 = arith.constant 15 : i32
    %176 = tpu.dynamic_rotate %165 by %c15_i32_96 dim 1 : vector<8x512xf32>, i32 -> vector<8x512xf32>
    %177 = vector.extract_strided_slice %0 {offsets = [2, 0], sizes = [1, 512], strides = [1, 1]} : vector<9x512xf32> to vector<1x512xf32>
    %178 = vector.broadcast %177 : vector<1x512xf32> to vector<8x512xf32>
    %179 = arith.mulf %176, %178 : vector<8x512xf32>
    %c16_97 = arith.constant 16 : index
    %c0_98 = arith.constant 0 : index
    %180 = vector.load %arg9[%c16_97, %c0_98] : memref<144x512xf32, #tpu.memory_space<vmem>>, vector<8x512xf32>
    tpu.vector_store %arg9[%c16_97, %c0_98], %179 {strides = array<i32>} : memref<144x512xf32, #tpu.memory_space<vmem>>, vector<8x512xf32>,
    %c1_i32_99 = arith.constant 1 : i32
    %181 = tpu.dynamic_rotate %165 by %c1_i32_99 dim 1 : vector<8x512xf32>, i32 -> vector<8x512xf32>
    %182 = vector.extract_strided_slice %0 {offsets = [3, 0], sizes = [1, 512], strides = [1, 1]} : vector<9x512xf32> to vector<1x512xf32>
    %183 = vector.broadcast %182 : vector<1x512xf32> to vector<8x512xf32>
    %184 = arith.mulf %181, %183 : vector<8x512xf32>
    %c24_100 = arith.constant 24 : index
    %c0_101 = arith.constant 0 : index
    %185 = vector.load %arg9[%c24_100, %c0_101] : memref<144x512xf32, #tpu.memory_space<vmem>>, vector<8x512xf32>
    tpu.vector_store %arg9[%c24_100, %c0_101], %184 {strides = array<i32>} : memref<144x512xf32, #tpu.memory_space<vmem>>, vector<8x512xf32>,
    %c32_102 = arith.constant 32 : index
    %c0_103 = arith.constant 0 : index
    %186 = vector.load %arg9[%c32_102, %c0_103] : memref<144x512xf32, #tpu.memory_space<vmem>>, vector<8x512xf32>
    tpu.vector_store %arg9[%c32_102, %c0_103], %165 {strides = array<i32>} : memref<144x512xf32, #tpu.memory_space<vmem>>, vector<8x512xf32>,
    %c511_i32_104 = arith.constant 511 : i32
    %187 = tpu.dynamic_rotate %165 by %c511_i32_104 dim 1 : vector<8x512xf32>, i32 -> vector<8x512xf32>
    %188 = vector.extract_strided_slice %0 {offsets = [5, 0], sizes = [1, 512], strides = [1, 1]} : vector<9x512xf32> to vector<1x512xf32>
    %189 = vector.broadcast %188 : vector<1x512xf32> to vector<8x512xf32>
    %190 = arith.mulf %187, %189 : vector<8x512xf32>
    %c40_105 = arith.constant 40 : index
    %c0_106 = arith.constant 0 : index
    %191 = vector.load %arg9[%c40_105, %c0_106] : memref<144x512xf32, #tpu.memory_space<vmem>>, vector<8x512xf32>
    tpu.vector_store %arg9[%c40_105, %c0_106], %190 {strides = array<i32>} : memref<144x512xf32, #tpu.memory_space<vmem>>, vector<8x512xf32>,
    %c497_i32_107 = arith.constant 497 : i32
    %192 = tpu.dynamic_rotate %165 by %c497_i32_107 dim 1 : vector<8x512xf32>, i32 -> vector<8x512xf32>
    %193 = vector.extract_strided_slice %0 {offsets = [6, 0], sizes = [1, 512], strides = [1, 1]} : vector<9x512xf32> to vector<1x512xf32>
    %194 = vector.broadcast %193 : vector<1x512xf32> to vector<8x512xf32>
    %195 = arith.mulf %192, %194 : vector<8x512xf32>
    %c48_108 = arith.constant 48 : index
    %c0_109 = arith.constant 0 : index
    %196 = vector.load %arg9[%c48_108, %c0_109] : memref<144x512xf32, #tpu.memory_space<vmem>>, vector<8x512xf32>
    tpu.vector_store %arg9[%c48_108, %c0_109], %195 {strides = array<i32>} : memref<144x512xf32, #tpu.memory_space<vmem>>, vector<8x512xf32>,
    %c496_i32_110 = arith.constant 496 : i32
    %197 = tpu.dynamic_rotate %165 by %c496_i32_110 dim 1 : vector<8x512xf32>, i32 -> vector<8x512xf32>
    %198 = vector.extract_strided_slice %0 {offsets = [7, 0], sizes = [1, 512], strides = [1, 1]} : vector<9x512xf32> to vector<1x512xf32>
    %199 = vector.broadcast %198 : vector<1x512xf32> to vector<8x512xf32>
    %200 = arith.mulf %197, %199 : vector<8x512xf32>
    %c56_111 = arith.constant 56 : index
    %c0_112 = arith.constant 0 : index
    %201 = vector.load %arg9[%c56_111, %c0_112] : memref<144x512xf32, #tpu.memory_space<vmem>>, vector<8x512xf32>
    tpu.vector_store %arg9[%c56_111, %c0_112], %200 {strides = array<i32>} : memref<144x512xf32, #tpu.memory_space<vmem>>, vector<8x512xf32>,
    %c495_i32_113 = arith.constant 495 : i32
    %202 = tpu.dynamic_rotate %165 by %c495_i32_113 dim 1 : vector<8x512xf32>, i32 -> vector<8x512xf32>
    %203 = vector.extract_strided_slice %0 {offsets = [8, 0], sizes = [1, 512], strides = [1, 1]} : vector<9x512xf32> to vector<1x512xf32>
    %204 = vector.broadcast %203 : vector<1x512xf32> to vector<8x512xf32>
    %205 = arith.mulf %202, %204 : vector<8x512xf32>
    %c64_114 = arith.constant 64 : index
    %c0_115 = arith.constant 0 : index
    %206 = vector.load %arg9[%c64_114, %c0_115] : memref<144x512xf32, #tpu.memory_space<vmem>>, vector<8x512xf32>
    tpu.vector_store %arg9[%c64_114, %c0_115], %205 {strides = array<i32>} : memref<144x512xf32, #tpu.memory_space<vmem>>, vector<8x512xf32>,
    %c32_116 = arith.constant 32 : index
    %c0_117 = arith.constant 0 : index
    %207 = vector.load %arg2[%c32_116, %c0_117] : memref<112x144xbf16, #tpu.memory_space<vmem>>, vector<8x72xbf16>
    %c0_118 = arith.constant 0 : index
    %c0_119 = arith.constant 0 : index
    %208 = vector.load %arg9[%c0_118, %c0_119] : memref<144x512xf32, #tpu.memory_space<vmem>>, vector<72x512xf32>
    %209 = arith.truncf %208 : vector<72x512xf32> to vector<72x512xbf16>
    %cst_120 = arith.constant dense<0.000000e+00> : vector<8x512xf32>
    %210 = tpu.matmul %207, %209, %cst_120 {dimension_numbers = #tpu.dot_dimension_numbers<[1], [0], [0], [1], [0, 0, 1, 1], [], []>} : vector<8x72xbf16>, vector<72x512xbf16>, vector<8x512xf32> -> vector<8x512xf32>
    %c48_121 = arith.constant 48 : index
    %c0_122 = arith.constant 0 : index
    %211 = vector.load %arg2[%c48_121, %c0_122] : memref<112x144xbf16, #tpu.memory_space<vmem>>, vector<8x72xbf16>
    %cst_123 = arith.constant dense<0.000000e+00> : vector<8x512xf32>
    %212 = tpu.matmul %211, %52, %cst_123 {dimension_numbers = #tpu.dot_dimension_numbers<[1], [0], [0], [1], [0, 0, 1, 1], [], []>} : vector<8x72xbf16>, vector<72x512xbf16>, vector<8x512xf32> -> vector<8x512xf32>
    %213 = arith.addf %210, %212 : vector<8x512xf32>
    %c48_124 = arith.constant 48 : index
    %c0_125 = arith.constant 0 : index
    %214 = vector.load %arg3[%c48_124, %c0_125] : memref<64x1xf32, #tpu.memory_space<vmem>>, vector<8x1xf32>
    %215 = vector.broadcast %214 : vector<8x1xf32> to vector<8x512xf32>
    %216 = arith.addf %213, %215 : vector<8x512xf32>
    %cst_126 = arith.constant 0.000000e+00 : f32
    %217 = vector.broadcast %cst_126 : f32 to vector<8x512xf32>
    %218 = arith.maximumf %216, %217 : vector<8x512xf32>
    %c96_127 = arith.constant 96 : index
    %c0_128 = arith.constant 0 : index
    %219 = vector.load %arg2[%c96_127, %c0_128] : memref<112x144xbf16, #tpu.memory_space<vmem>>, vector<4x8xbf16>
    %220 = arith.truncf %218 : vector<8x512xf32> to vector<8x512xbf16>
    %cst_129 = arith.constant dense<0.000000e+00> : vector<4x512xf32>
    %221 = tpu.matmul %219, %220, %cst_129 {dimension_numbers = #tpu.dot_dimension_numbers<[1], [0], [0], [1], [0, 0, 1, 1], [], []>} : vector<4x8xbf16>, vector<8x512xbf16>, vector<4x512xf32> -> vector<4x512xf32>
    %c56_130 = arith.constant 56 : index
    %c0_131 = arith.constant 0 : index
    %222 = vector.load %arg3[%c56_130, %c0_131] : memref<64x1xf32, #tpu.memory_space<vmem>>, vector<4x1xf32>
    %223 = vector.broadcast %222 : vector<4x1xf32> to vector<4x512xf32>
    %224 = arith.addf %221, %223 : vector<4x512xf32>
    %c0_132 = arith.constant 0 : index
    %c0_133 = arith.constant 0 : index
    %225 = vector.load %arg1[%c0_132, %c0_133] : memref<4x512xf32, #tpu.memory_space<vmem>>, vector<4x512xf32>
    %226 = arith.subf %224, %225 : vector<4x512xf32>
    %227 = arith.mulf %226, %226 : vector<4x512xf32>
    %cst_134 = arith.constant dense<0.000000e+00> : vector<4xf32>
    %228 = vector.multi_reduction <add>, %227, %cst_134 [1] : vector<4x512xf32> to vector<4xf32>
    %229 = vector.shape_cast %228 : vector<4xf32> to vector<4x1xf32>
    %cst_135 = arith.constant dense<0.000000e+00> : vector<1xf32>
    %230 = vector.multi_reduction <add>, %229, %cst_135 [0] : vector<4x1xf32> to vector<1xf32>
    %231 = vector.shape_cast %230 : vector<1xf32> to vector<1x1xf32>
    %cst_136 = arith.constant 4.8828125E-4 : f32
    %232 = vector.broadcast %cst_136 : f32 to vector<1x1xf32>
    %233 = arith.mulf %231, %232 : vector<1x1xf32>
    %c0_137 = arith.constant 0 : index
    %c0_138 = arith.constant 0 : index
    %234 = vector.load %arg7[%c0_137, %c0_138] : memref<1x1xf32, #tpu.memory_space<vmem>>, vector<1x1xf32>
    tpu.vector_store %arg7[%c0_137, %c0_138], %233 {strides = array<i32>} : memref<1x1xf32, #tpu.memory_space<vmem>>, vector<1x1xf32>,
    return
  }
}

</mosaic_0001>

<bundles_post_ra>
// kernel: ensemble_forward.1
= control target key start
LH: loop header
LB: loop body
LE: loop exit
PB: predicated region body
PF: predicated region fallthrough
CT: control target
= control target key end

     0   :  { %vm109_vm0 = vcmask 1041408   ;;  %v4634_v16 = vmov 0   ;;  %vm105_vm1 = vcmask 293888   ;;  %s4626_s0 = inlined_call_operand.vmem [shape: bf16[36,512], index: 0, kind: input, shape index: {}]   ;;  %s4627_s1 = inlined_call_operand.vmem [shape: f32[4,512], index: 1, kind: input, shape index: {}]   ;;  %s4628_s2 = inlined_call_operand.vmem [shape: bf16[112,144], index: 2, kind: input, shape index: {}]   ;;  %s4629_s3 = inlined_call_operand.vmem [shape: f32[64,1], index: 3, kind: input, shape index: {}]   ;;  %s4630_s4 = inlined_call_operand.vmem [shape: bf16[512,128], index: 4, kind: input, shape index: {}]   ;;  %s4631_s5 = inlined_call_operand.vmem [shape: bf16[128,512], index: 5, kind: input, shape index: {}]   ;;  %s4632_s6 = inlined_call_operand.vmem [shape: f32[9,640], index: 6, kind: input, shape index: {}]   ;;  %s4633_s7 = inlined_call_operand.hbm [shape: f32[1,1], index: 7, kind: output, shape index: {}]  }
   0x1   :  { %v47_v0 = vld [vmem:[%s4626_s0 + $0x40] sm:$0x33]  ;;  %v48_v1 = vld [vmem:[%s4626_s0 + $0x48] sm:$0x33]  ;;  %154 = vmatprep.mubr.bf16.mxu0 %v4634_v16  ;;  %195 = vmatprep.mubr.bf16.mxu1 %v4634_v16 }
   0x2   :  { %v2629_v2 = vcombine.high %v47_v0, %v47_v0  ;;  %v2631_v3 = vcombine.high %v48_v1, %v48_v1  ;;  %v2628_v4 = vcombine.low %v47_v0, %v47_v0  ;;  %v2630_v5 = vcombine.low %v48_v1, %v48_v1  ;;  %v2795_v6 = vld [vmem:[%s4626_s0 + $0x24] ss:$16 sps:$4 sm:$0xff]   ;;  %v2797_v7 = vld [vmem:[%s4626_s0 + $0x2c] ss:$16 sps:$4 sm:$0xff]   ;;  %v2799_v8 = vld [vmem:[%s4626_s0 + $0x20] ss:$16 sps:$4 sm:$0xff]   ;;  %2789 = vset.pattern.permute.xlu0 %v4634_v16 }
   0x3   :  { %v2800_v11 = vld [vmem:[%s4626_s0 + $0x28] ss:$16 sps:$4 sm:$0xff]   ;;  %v2801_v12 = vld [vmem:[%s4626_s0 + $0x4] ss:$16 sps:$4 sm:$0xff]   ;;  %v2803_v13 = vld [vmem:[%s4626_s0 + $0xc] ss:$16 sps:$4 sm:$0xff]   ;;  %2790 = vset.pattern.permute.xlu1 %v4634_v16 }
   0x4   :  { %2632 = vmatprep.subr.msk.bf16.mxu0 %vm109_vm0, %v2629_v2  ;;  %2634 = vmatprep.subr.msk.bf16.mxu1 %vm109_vm0, %v2631_v3  ;;  %v111_v9 = vsel %vm109_vm0, %v2628_v4, 0  ;;  %v117_v10 = vsel %vm109_vm0, %v2630_v5, 0  ;;  %v2805_v14 = vld [vmem:[%s4626_s0] ss:$16 sps:$4 sm:$0xff]   ;;  %v2806_v15 = vld [vmem:[%s4626_s0 + $0x8] ss:$16 sps:$4 sm:$0xff]  }
   0x5   :  { %133 = vmatpush1.bf16.msra.mxu0 %v111_v9  ;;  %174 = vmatpush1.bf16.msra.mxu1 %v117_v10  ;;  %v49_v17 = vld [vmem:[%s4629_s3] sm:$0xff] }
   0x6   :  { %134 = vmatprep.subr.bf16.mxu0 %v2795_v6  ;;  %175 = vmatprep.subr.bf16.mxu1 %v2797_v7  ;;  %v38_v18 = vld [vmem:[%s4628_s2] sm:$0xf] }
   0x7   :  { %52 = vperm.xlu0 %2789, %v49_v17  }
   0x9   :  { %135 = vmatpush1.bf16.msra.mxu0 %v2799_v8  ;;  %176 = vmatpush1.bf16.msra.mxu1 %v2800_v11 }
   0xa   :  { %136 = vmatprep.subr.bf16.mxu0 %v2801_v12  ;;  %177 = vmatprep.subr.bf16.mxu1 %v2803_v13 }
   0xd   :  { %137 = vmatpush1.bf16.msra.mxu0 %v2805_v14  ;;  %178 = vmatpush1.bf16.msra.mxu1 %v2806_v15 }
  0x10   :  { %2633 = vmatmul.mubr.msk.bf16.vlgmr.msra.gmra.mxu0 %vm105_vm1, %v38_v18  ;;  %2635 = vmatmul.mubr.msk.bf16.vlgmr.msra.gmra.mxu1 %vm105_vm1, %v38_v18 }
  0x11   :  { %622 = vmatprep.mubr.bf16.mxu0 %v4634_v16  ;;  %665 = vmatprep.mubr.bf16.mxu1 %v4634_v16 }
  0x12   :  { %12 = vsyncpa [#allocation6], 0  ;;  %s2922_s24 = smov 111   ;;  %s2923_s25 = smov 113   ;;  %v745_v36 = vld [vmem:[%s4629_s3 + $0x10] sm:$0xff]  ;;  %v216_v45 = vlaneseq  ;;  %vm577_vm3 = vcmask 1043456  }
  0x13   :  { %s2924_s26 = smov 127   ;;  %s2925_s27 = smov 112   ;;  %v2638_v51 = vld [vmem:[%s4632_s6 + $0x38] ss:$0 sm:$0xff]  ;;  %v2639_v52 = vld [vmem:[%s4632_s6 + $0x40] ss:$0 sm:$0xff] }
  0x14   :  { %s2926_s28 = smov 15   ;;  %s2927_s29 = smov 1   ;;  %v3110_v48 = vand.u32 127, %v216_v45  ;;  %v3125_v55 = vshrl.u32 %v216_v45, 7  ;;  %v3143_v1 = vld [vmem:[%s4632_s6 + $0x10] sm:$0xff]  ;;  %v3148_v2 = vld [vmem:[%s4632_s6 + $0x18] sm:$0xff] }
  0x15   :  { %s2928_s30 = smov 17   ;;  %s2929_s8 = smov 16   ;;  %v2636_v5 = vld [vmem:[%s4632_s6 + $0x28] ss:$0 sm:$0xff]  ;;  %v2637_v6 = vld [vmem:[%s4632_s6 + $0x30] ss:$0 sm:$0xff] }
  0x16   :  { %vm481_vm2 = vcmp.lt.s32.totalorder %v3110_v48, 111  ;;  %v3136_v63 = vsub.s32 7, %v3125_v55  ;;  %v3156_v4 = vsub.s32 5, %v3125_v55  ;;  %v3166_v7 = vsub.s32 6, %v3125_v55  ;;  %v3176_v11 = vld [vmem:[%s4632_s6] sm:$0xff]  ;;  %v3181_v12 = vld [vmem:[%s4632_s6 + $0x8] sm:$0xff] }
  0x17   :  { %vm444_vm4 = vcmp.lt.s32.totalorder %v3110_v48, 112  ;;  %v3184_v13 = vsub.s32 2, %v3125_v55  ;;  %vm370_vm5 = vcmp.lt.s32.totalorder %v3110_v48, 127  ;;  %vm407_vm6 = vcmp.lt.s32.totalorder %v3110_v48, 113  ;;  %s2931_s15 = smov 121   ;;  %s2932_s16 = smov 7  }
  0x18   :  { %v3171_v8 = vrot.slane %v3143_v1, %v3136_v63  ;;  %v3188_v14 = vrot.slane %v3148_v2, %v3136_v63  ;;  %vm292_vm7 = vcmp.lt.s32.totalorder %v3110_v48, 15  ;;  %vm329_vm8 = vcmp.lt.s32.totalorder %v3110_v48, 1  ;;  %s2933_s17 = smov 8   ;;  %s2934_s18 = smov 9  }
  0x19   :  { %vm218_vm9 = vcmp.lt.s32.totalorder %v3110_v48, 17  ;;  %vm255_vm10 = vcmp.lt.s32.totalorder %v3110_v48, 16  ;;  %vm573_vm11 = vcmask 588800   ;;  %vm1180_vm12 = vcmask 130048   ;;  %s2935_s21 = smov 119  }
  0x1a   :  { %vm2473_vm13 = vcmask 64512   ;;  %vm2604_vm14 = vcmask 0  }
  0x82   :  { %v53_v19 = vpop.permute.xlu0 %52 }
  0xd0   :  { %v156_v20 = vpop.f32.mrf.mxu0  ;;  %v197_v21 = vpop.f32.mrf.mxu1 }
  0xd1   :  { %v157_v22 = vadd.f32 %v156_v20, %v53_v19  ;;  %v198_v23 = vadd.f32 %v197_v21, %v53_v19  ;;  %v3197_v20 = vrot.slane %v3143_v1, %v3156_v4  ;;  %v3200_v21 = vsub.s32 3, %v3125_v55 }
  0xd2   :  { %v158_v24 = vpop.f32.mrf.mxu0  ;;  %v199_v25 = vpop.f32.mrf.mxu1 }
  0xd3   :  { %v3019_v26 = vmax.f32 %v157_v22, 0.0  ;;  %v3021_v27 = vmax.f32 %v198_v23, 0.0  ;;  %v200_v32 = vadd.f32 %v199_v25, %v53_v19  ;;  %v159_v34 = vadd.f32 %v158_v24, %v53_v19 }
  0xd4   :  { %v160_v28 = vpop.f32.mrf.mxu0  ;;  %v201_v29 = vpop.f32.mrf.mxu1  ;;  %v3204_v22 = vrot.slane %v3148_v2, %v3156_v4  ;;  %v3209_v23 = vrot.slane %v3176_v11, %v3166_v7  ;;  %v3213_v24 = vrot.slane %v3181_v12, %v3166_v7  ;;  %v3248_v45 = vrot.slane %v3143_v1, %v3200_v21 }
  0xd5   :  { %477 = vrot.lane.b32.xlu1 %v3021_v27, %s2922_s24  ;;  %473 = vrot.lane.b32.xlu0 %v3019_v26, %s2922_s24  ;;  %v3047_v33 = vmax.f32 %v200_v32, 0.0  ;;  %v3057_v35 = vmax.f32 %v159_v34, 0.0  ;;  %v3225_v32 = vsub.s32 0, %v3125_v55  ;;  %v3229_v34 = vrot.slane %v3143_v1, %v3184_v13 }
  0xd6   :  { %v161_v30 = vpop.f32.mrf.mxu0  ;;  %v202_v31 = vpop.f32.mrf.mxu1  ;;  %4699 = vst [vmem:[#allocation10_spill] sm:$0xff] %v3213_v24  ;;  %4705 = vst [vmem:[#allocation16_spill] sm:$0xff] %v3248_v45 }
  0xd7   :  { %v3222_v31 = vrot.slane %v3181_v12, %v3184_v13  ;;  %4701 = vst [vmem:[#allocation12_spill] sm:$0xff] %v3229_v34 }
  0xd9   :  { %399 = vrot.lane.b32.xlu1 %v3019_v26, %s2923_s25  ;;  %403 = vrot.lane.b32.xlu0 %v3021_v27, %s2923_s25 }
  0xdd   :  { %362 = vrot.lane.b32.xlu1 %v3019_v26, %s2924_s26  ;;  %440 = vrot.lane.b32.xlu0 %v3021_v27, %s2925_s27 }
  0xe1   :  { %284 = vrot.lane.b32.xlu1 %v3019_v26, %s2926_s28  ;;  %436 = vrot.lane.b32.xlu0 %v3019_v26, %s2925_s27 }
  0xe5   :  { %321 = vrot.lane.b32.xlu1 %v3019_v26, %s2927_s29  ;;  %366 = vrot.lane.b32.xlu0 %v3021_v27, %s2924_s26 }
  0xe9   :  { %288 = vrot.lane.b32.xlu1 %v3021_v27, %s2926_s28  ;;  %325 = vrot.lane.b32.xlu0 %v3021_v27, %s2927_s29 }
  0xed   :  { %208 = vrot.lane.b32.xlu1 %v3019_v26, %s2928_s30  ;;  %479 = vrot.lane.b32.xlu0 %v3047_v33, %s2922_s24 }
  0xf1   :  { %247 = vrot.lane.b32.xlu1 %v3019_v26, %s2929_s8  ;;  %442 = vrot.lane.b32.xlu0 %v3047_v33, %s2925_s27 }
  0xf5   :  { %475 = vrot.lane.b32.xlu1 %v3057_v35, %s2922_s24  ;;  %368 = vrot.lane.b32.xlu0 %v3047_v33, %s2924_s26 }
  0xf9   :  { %401 = vrot.lane.b32.xlu1 %v3057_v35, %s2923_s25  ;;  %286 = vrot.lane.b32.xlu0 %v3057_v35, %s2926_s28 }
  0xfd   :  { %438 = vrot.lane.b32.xlu1 %v3057_v35, %s2925_s27  ;;  %323 = vrot.lane.b32.xlu0 %v3057_v35, %s2927_s29 }
 0x101   :  { %405 = vrot.lane.b32.xlu1 %v3047_v33, %s2923_s25  ;;  %327 = vrot.lane.b32.xlu0 %v3047_v33, %s2927_s29 }
 0x105   :  { %364 = vrot.lane.b32.xlu1 %v3057_v35, %s2924_s26  ;;  %210 = vrot.lane.b32.xlu0 %v3057_v35, %s2928_s30 }
 0x109   :  { %290 = vrot.lane.b32.xlu1 %v3047_v33, %s2926_s28  ;;  %249 = vrot.lane.b32.xlu0 %v3057_v35, %s2929_s8 }
 0x10d   :  { %214 = vrot.lane.b32.xlu1 %v3047_v33, %s2928_s30  ;;  %253 = vrot.lane.b32.xlu0 %v3047_v33, %s2929_s8 }
 0x111   :  { %212 = vrot.lane.b32.xlu1 %v3021_v27, %s2928_s30  ;;  %251 = vrot.lane.b32.xlu0 %v3021_v27, %s2929_s8 }
 0x115   :  { %753 = vperm.xlu0 %2789, %v745_v36   ;;  %v3233_v36 = vrot.slane %v3176_v11, %v3136_v63 }
 0x117   :  { %4702 = vst [vmem:[#allocation13_spill] sm:$0xff] %v3233_v36 }
 0x147   :  { %v478_v37 = vpop.permute.xlu1 %477  ;;  %v474_v38 = vpop.permute.xlu0 %473 }
 0x14b   :  { %v3094_v39 = vpop.permute.xlu1 %399  ;;  %v3096_v40 = vpop.permute.xlu0 %403 }
 0x14f   :  { %v3098_v41 = vpop.permute.xlu1 %362  ;;  %v3100_v42 = vpop.permute.xlu0 %440 }
 0x153   :  { %v3102_v43 = vpop.permute.xlu1 %284  ;;  %v3104_v44 = vpop.permute.xlu0 %436 }
 0x157   :  { %v3106_v46 = vpop.permute.xlu1 %321  ;;  %v3108_v47 = vpop.permute.xlu0 %366 }
 0x15b   :  { %v3112_v49 = vpop.permute.xlu1 %288  ;;  %v3114_v50 = vpop.permute.xlu0 %325 }
 0x15f   :  { %v3123_v53 = vpop.permute.xlu1 %208  ;;  %v480_v54 = vpop.permute.xlu0 %479 }
 0x160   :  { %v482_v56 = vsel %vm481_vm2, %v478_v37, %v480_v54  ;;  %v485_v57 = vsel %vm481_vm2, %v480_v54, %v474_v38 }
 0x161   :  { %v504_v58 = vmul.f32 %v2638_v51, %v482_v56  ;;  %v505_v59 = vmul.f32 %v2639_v52, %v485_v57  ;;  %v3252_v51 = vrot.slane %v3143_v1, %v3166_v7  ;;  %v3256_v52 = vrot.slane %v3148_v2, %v3166_v7 }
 0x163   :  { %v564_v60 = vpack.c.bf16 %v504_v58, %v504_v58  ;;  %v3131_v61 = vpack.c.bf16 %v505_v59, %v505_v59  ;;  %v3133_v62 = vpop.permute.xlu1 %247  ;;  %v3138_v0 = vpop.permute.xlu0 %442  ;;  %v3269_v58 = vrot.slane %v3176_v11, %v3200_v21 }
 0x165   :  { %4697 = vst [vmem:[#allocation8_spill] sm:$0xff] %v3131_v61  ;;  %2643 = vmatprep.subr.msk.bf16.mxu1 %vm577_vm3, %v3131_v61  ;;  %v3153_v3 = vsel %vm577_vm3, %v564_v60, 0  ;;  %4707 = vst [vmem:[#allocation18_spill] sm:$0xff] %v3269_v58 }
 0x166   :  { %4698 = vst [vmem:[#allocation9_spill] sm:$0xff] %v3153_v3  ;;  %640 = vmatpush1.bf16.msra.mxu1 %v3153_v3 }
 0x167   :  { %v476_v9 = vpop.permute.xlu1 %475  ;;  %v369_v10 = vpop.permute.xlu0 %368 }
 0x168   :  { %v483_v15 = vsel %vm481_vm2, %v476_v9, %v478_v37  ;;  %v484_v17 = vsel %vm481_vm2, %v474_v38, %v476_v9  ;;  %v3237_v37 = vrot.slane %v3181_v12, %v3136_v63  ;;  %v3244_v38 = vrot.slane %v3181_v12, %v3200_v21 }
 0x169   :  { %v502_v18 = vmul.f32 %v2636_v5, %v484_v17  ;;  %v503_v19 = vmul.f32 %v2637_v6, %v483_v15  ;;  %v3274_v5 = vrot.slane %v3148_v2, %v3200_v21  ;;  %v3278_v6 = vrot.slane %v3176_v11, %v3156_v4 }
 0x16a   :  { %4703 = vst [vmem:[#allocation14_spill] sm:$0xff] %v3237_v37  ;;  %4704 = vst [vmem:[#allocation15_spill] sm:$0xff] %v3244_v38  ;;  %v3282_v9 = vrot.slane %v3181_v12, %v3156_v4  ;;  %v3286_v15 = vrot.slane %v3181_v12, %v3225_v32  ;;  %v445_v17 = vsel %vm444_vm4, %v3100_v42, %v3138_v0 }
 0x16b   :  { %v562_v25 = vpack.c.bf16 %v502_v18, %v502_v18  ;;  %v3215_v28 = vpack.c.bf16 %v503_v19, %v503_v19  ;;  %v402_v29 = vpop.permute.xlu1 %401  ;;  %v3218_v30 = vpop.permute.xlu0 %286  ;;  %4708 = vst [vmem:[#allocation19_spill] sm:$0xff] %v3274_v5  ;;  %4709 = vst [vmem:[#allocation20_spill] sm:$0xff] %v3278_v6 }
 0x16c   :  { %v409_v54 = vsel %vm407_vm6, %v402_v29, %v3096_v40  ;;  %v410_v56 = vsel %vm407_vm6, %v3094_v39, %v402_v29  ;;  %4710 = vst [vmem:[#allocation21_spill] sm:$0xff] %v3282_v9  ;;  %4711 = vst [vmem:[#allocation22_spill] sm:$0xff] %v3286_v15 }
 0x16d   :  { %4700 = vst [vmem:[#allocation11_spill] sm:$0xff] %v3215_v28  ;;  %2641 = vmatprep.subr.msk.bf16.mxu0 %vm577_vm3, %v3215_v28  ;;  %v3265_v57 = vsel %vm577_vm3, %v562_v25, 0  ;;  %v3299_v25 = vsub.s32 1, %v3125_v55  ;;  %v428_v29 = vmul.f32 %v3209_v23, %v410_v56  ;;  %v429_v16 = vmul.f32 %v3213_v24, %v409_v54 }
 0x16e   :  { %4706 = vst [vmem:[#allocation17_spill] sm:$0xff] %v3265_v57  ;;  %597 = vmatpush1.bf16.msra.mxu0 %v3265_v57  ;;  %v374_v55 = vsel %vm370_vm5, %v369_v10, %v3098_v41  ;;  %v3315_v56 = vrot.slane %v3176_v11, %v3184_v13  ;;  %v3319_v54 = vrot.slane %v3148_v2, %v3184_v13 }
 0x16f   :  { %v439_v59 = vpop.permute.xlu1 %438  ;;  %v324_v60 = vpop.permute.xlu0 %323  ;;  %v467_v57 = vmul.f32 %v3171_v8, %v445_v17 }
 0x170   :  { %v446_v18 = vsel %vm444_vm4, %v439_v59, %v3100_v42  ;;  %v447_v19 = vsel %vm444_vm4, %v3104_v44, %v439_v59  ;;  %v448_v42 = vsel %vm444_vm4, %v3138_v0, %v3104_v44  ;;  %4712 = vst [vmem:[#allocation23_spill] sm:$0xff] %v3315_v56  ;;  %4713 = vst [vmem:[#allocation24_spill] sm:$0xff] %v3319_v54 }
 0x171   :  { %v465_v3 = vmul.f32 %v3233_v36, %v447_v19  ;;  %v466_v61 = vmul.f32 %v3237_v37, %v446_v18  ;;  %v371_v59 = vsel %vm370_vm5, %v3108_v47, %v369_v10  ;;  %v332_v28 = vsel %vm329_vm8, %v3106_v46, %v324_v60 }
 0x172   :  { %v468_v10 = vmul.f32 %v3188_v14, %v448_v42  ;;  %v331_v42 = vsel %vm329_vm8, %v324_v60, %v3114_v50 }
 0x173   :  { %v3324_v18 = vpack.c.bf16 %v465_v3, %v428_v29  ;;  %v406_v19 = vpop.permute.xlu1 %405  ;;  %v328_v44 = vpop.permute.xlu0 %327  ;;  %v3326_v0 = vpack.c.bf16 %v466_v61, %v429_v16  ;;  %v394_v16 = vmul.f32 %v3204_v22, %v374_v55  ;;  %v393_v29 = vmul.f32 %v3197_v20, %v371_v59 }
 0x174   :  { %v408_v24 = vsel %vm407_vm6, %v3096_v40, %v406_v19  ;;  %v411_v3 = vsel %vm407_vm6, %v406_v19, %v3094_v39  ;;  %v295_v40 = vsel %vm292_vm7, %v3102_v43, %v3218_v30  ;;  %v3352_v39 = vrot.slane %v3181_v12, %v3299_v25 }
 0x175   :  { %4714 = vst [vmem:[#allocation25_spill] sm:$0xff] %v3324_v18  ;;  %4715 = vst [vmem:[#allocation26_spill] sm:$0xff] %v3326_v0  ;;  %v430_v61 = vmul.f32 %v3252_v51, %v408_v24  ;;  %v431_v17 = vmul.f32 %v3256_v52, %v411_v3  ;;  %598 = vmatprep.subr.bf16.mxu0 %v3326_v0  ;;  %v3356_v24 = vrot.slane %v3176_v11, %v3225_v32 }
 0x176   :  { %599 = vmatpush1.bf16.msra.mxu0 %v3324_v18  ;;  %4716 = vst [vmem:[#allocation27_spill] sm:$0xff] %v3352_v39  ;;  %v351_v55 = vmul.f32 %v3244_v38, %v332_v28  ;;  %v333_v12 = vsel %vm329_vm8, %v328_v44, %v3106_v46  ;;  %v3377_v28 = vrot.slane %v3176_v11, %v3299_v25 }
 0x177   :  { %4717 = vst [vmem:[#allocation28_spill] sm:$0xff] %v3356_v24  ;;  %v3362_v59 = vpack.c.bf16 %v467_v57, %v430_v61  ;;  %v365_v19 = vpop.permute.xlu1 %364  ;;  %v211_v3 = vpop.permute.xlu0 %210  ;;  %v3364_v0 = vpack.c.bf16 %v468_v10, %v431_v17  ;;  %v314_v57 = vmul.f32 %v3222_v31, %v295_v40  ;;  %v3384_v46 = vpack.c.bf16 %v394_v16, %v3047_v33 }
 0x178   :  { %v372_v18 = vsel %vm370_vm5, %v365_v19, %v3108_v47  ;;  %v373_v60 = vsel %vm370_vm5, %v3098_v41, %v365_v19  ;;  %4720 = vst [vmem:[#allocation31_spill] sm:$0xff] %v3377_v28  ;;  %v3387_v47 = vpack.c.bf16 %v393_v29, %v3021_v27  ;;  %v294_v41 = vsel %vm292_vm7, %v3218_v30, %v3112_v49 }
 0x179   :  { %4718 = vst [vmem:[#allocation29_spill] sm:$0xff] %v3362_v59  ;;  %4719 = vst [vmem:[#allocation30_spill] sm:$0xff] %v3364_v0  ;;  %v391_v10 = vmul.f32 %v3278_v6, %v373_v60  ;;  %v392_v61 = vmul.f32 %v3282_v9, %v372_v18  ;;  %641 = vmatprep.subr.bf16.mxu1 %v3364_v0  ;;  %v352_v11 = vmul.f32 %v3248_v45, %v331_v42 }
 0x17a   :  { %4721 = vst [vmem:[#allocation32_spill] sm:$0xff] %v3384_v46  ;;  %4722 = vst [vmem:[#allocation33_spill] sm:$0xff] %v3387_v47  ;;  %v330_v17 = vsel %vm329_vm8, %v3114_v50, %v328_v44  ;;  %642 = vmatpush1.bf16.msra.mxu1 %v3362_v59  ;;  %v350_v18 = vmul.f32 %v3269_v58, %v333_v12  ;;  %v3406_v30 = vpack.c.bf16 %v351_v55, %v314_v57 }
 0x17b   :  { %v3400_v33 = vpack.c.bf16 %v391_v10, %v3019_v26  ;;  %v291_v27 = vpop.permute.xlu1 %290  ;;  %v250_v16 = vpop.permute.xlu0 %249  ;;  %643 = vmatprep.subr.bf16.mxu1 %v3384_v46  ;;  %v3404_v29 = vpack.c.bf16 %v392_v61, %v3057_v35  ;;  %v221_v50 = vsel %vm218_vm9, %v3123_v53, %v211_v3  ;;  %v353_v35 = vmul.f32 %v3274_v5, %v330_v17 }
 0x17c   :  { %4725 = vst [vmem:[#allocation36_spill] sm:$0xff] %v3406_v30  ;;  %v293_v44 = vsel %vm292_vm7, %v3112_v49, %v291_v27  ;;  %v296_v26 = vsel %vm292_vm7, %v291_v27, %v3102_v43  ;;  %v258_v40 = vsel %vm255_vm10, %v3133_v62, %v250_v16  ;;  %v315_v49 = vmul.f32 %v3229_v34, %v294_v41 }
 0x17d   :  { %4723 = vst [vmem:[#allocation34_spill] sm:$0xff] %v3400_v33  ;;  %4724 = vst [vmem:[#allocation35_spill] sm:$0xff] %v3404_v29  ;;  %v313_v42 = vmul.f32 %v3315_v56, %v296_v26  ;;  %v316_v55 = vmul.f32 %v3319_v54, %v293_v44  ;;  %v277_v19 = vmul.f32 %v3352_v39, %v258_v40  ;;  %600 = vmatprep.subr.bf16.mxu0 %v3404_v29 }
 0x17e   :  { %601 = vmatpush1.bf16.msra.mxu0 %v3400_v33  ;;  %644 = vmatpush1.bf16.msra.mxu1 %v3387_v47  ;;  %v3430_v43 = vrot.slane %v3143_v1, %v3225_v32  ;;  %v240_v12 = vmul.f32 %v3286_v15, %v221_v50  ;;  %v3440_v41 = vrot.slane %v3148_v2, %v3225_v32 }
 0x17f   :  { %v3433_v60 = vpack.c.bf16 %v350_v18, %v313_v42  ;;  %v215_v57 = vpop.permute.xlu1 %214  ;;  %v254_v10 = vpop.permute.xlu0 %253  ;;  %602 = vmatprep.subr.bf16.mxu0 %v3406_v30  ;;  %v3436_v61 = vpack.c.bf16 %v353_v35, %v316_v55  ;;  %v3442_v17 = vpack.c.bf16 %v352_v11, %v315_v49  ;;  %v3452_v50 = vrot.slane %v3143_v1, %v3299_v25  ;;  %v2808_v35 = vld [vmem:[%s4630_s4 + $0x78] sm:$0xff]  }
 0x180   :  { %4726 = vst [vmem:[#allocation37_spill] sm:$0xff] %v3430_v43  ;;  %4729 = vst [vmem:[#allocation40_spill] sm:$0xff] %v3440_v41  ;;  %v222_v27 = vsel %vm218_vm9, %v215_v57, %v3123_v53  ;;  %v259_v18 = vsel %vm255_vm10, %v254_v10, %v3133_v62  ;;  %v3459_v11 = vrot.slane %v3148_v2, %v3299_v25 }
 0x181   :  { %4727 = vst [vmem:[#allocation38_spill] sm:$0xff] %v3433_v60  ;;  %4728 = vst [vmem:[#allocation39_spill] sm:$0xff] %v3436_v61  ;;  %v239_v44 = vmul.f32 %v3356_v24, %v222_v27  ;;  %v276_v26 = vmul.f32 %v3377_v28, %v259_v18  ;;  %645 = vmatprep.subr.bf16.mxu1 %v3436_v61  ;;  %v3461_v40 = vpack.c.bf16 %v277_v19, %v240_v12 }
 0x182   :  { %4730 = vst [vmem:[#allocation41_spill] sm:$0xff] %v3442_v17  ;;  %4731 = vst [vmem:[#allocation42_spill] sm:$0xff] %v3452_v50  ;;  %603 = vmatpush1.bf16.msra.mxu0 %v3433_v60  ;;  %646 = vmatpush1.bf16.msra.mxu1 %v3442_v17 }
 0x183   :  { %4732 = vst [vmem:[#allocation43_spill] sm:$0xff] %v3459_v11  ;;  %4733 = vst [vmem:[#allocation44_spill] sm:$0xff] %v3461_v40  ;;  %v3465_v53 = vpack.c.bf16 %v276_v26, %v239_v44  ;;  %v213_v62 = vpop.permute.xlu1 %212  ;;  %v252_v1 = vpop.permute.xlu0 %251  ;;  %604 = vmatprep.subr.bf16.mxu0 %v3461_v40  ;;  %v2810_v44 = vld [vmem:[%s4630_s4 + $0x70] sm:$0xff]   ;;  %v2811_v26 = vld [vmem:[%s4630_s4 + $0xf8] sm:$0xff]  }
 0x184   :  { %v219_v2 = vsel %vm218_vm9, %v213_v62, %v215_v57  ;;  %v220_v42 = vsel %vm218_vm9, %v211_v3, %v213_v62  ;;  %v256_v55 = vsel %vm255_vm10, %v252_v1, %v254_v10  ;;  %v257_v19 = vsel %vm255_vm10, %v250_v16, %v252_v1  ;;  %v2807_v57 = vld [vmem:[%s4628_s2 + $0x10] ss:$8 sps:$4 sm:$0xff]  }
 0x185   :  { %4734 = vst [vmem:[#allocation45_spill] sm:$0xff] %v3465_v53  ;;  %v241_v49 = vmul.f32 %v3430_v43, %v220_v42  ;;  %v242_v12 = vmul.f32 %v3440_v41, %v219_v2  ;;  %v278_v27 = vmul.f32 %v3452_v50, %v257_v19  ;;  %v279_v18 = vmul.f32 %v3459_v11, %v256_v55  ;;  %v2809_v3 = vld [vmem:[%s4630_s4 + $0x38] sm:$0xff]   ;;  %v2812_v62 = vld [vmem:[%s4630_s4 + $0x30] sm:$0xff]   ;;  %v2816_v42 = vld [vmem:[%s4630_s4 + $0x28] sm:$0xff]  }
 0x186   :  { %605 = vmatpush1.bf16.msra.mxu0 %v3465_v53  ;;  %v2813_v1 = vld [vmem:[%s4630_s4 + $0xb8] sm:$0xff]   ;;  %v2815_v2 = vld [vmem:[%s4630_s4 + $0xf0] sm:$0xff]   ;;  %v2818_v19 = vld [vmem:[%s4630_s4 + $0x60] sm:$0xff]  }
 0x187   :  { %v3490_v16 = vpack.c.bf16 %v278_v27, %v241_v49  ;;  %v3492_v10 = vpack.c.bf16 %v279_v18, %v242_v12  ;;  %2729 = vmatprep.subr.bf16.mxu0 %v2808_v35  ;;  %v2814_v35 = vld [vmem:[%s4630_s4 + $0x68] sm:$0xff]   ;;  %v2817_v55 = vld [vmem:[%s4630_s4 + $0xb0] sm:$0xff]   ;;  %v2820_v12 = vld [vmem:[%s4630_s4 + $0x20] sm:$0xff]  }
 0x188   :  { %v2819_v49 = vld [vmem:[%s4630_s4 + $0xe8] sm:$0xff]   ;;  %v2822_v18 = vld [vmem:[%s4630_s4 + $0x58] sm:$0xff]  }
 0x189   :  { %4735 = vst [vmem:[#allocation46_spill] sm:$0xff] %v3490_v16  ;;  %4736 = vst [vmem:[#allocation47_spill] sm:$0xff] %v3492_v10  ;;  %2642 = vmatmul.mubr.msk.bf16.vlgmr.msra.gmra.mxu0 %vm573_vm11, %v2807_v57  ;;  %647 = vmatprep.subr.bf16.mxu1 %v3492_v10  ;;  %v2821_v27 = vld [vmem:[%s4630_s4 + $0xa8] sm:$0xff]  }
 0x18a   :  { %648 = vmatpush1.bf16.msra.mxu1 %v3490_v16  ;;  %2730 = vmatpush3.bf16.msra.mxu0 %v2809_v3  ;;  %v2824_v3 = vld [vmem:[%s4630_s4 + $0x18] sm:$0xff]  }
 0x18b   :  { %2731 = vmatprep.subr.bf16.mxu0 %v2810_v44  ;;  %2751 = vmatprep.subr.bf16.mxu1 %v2811_v26  ;;  %v2825_v44 = vld [vmem:[%s4630_s4 + $0xa0] sm:$0xff]   ;;  %v2826_v26 = vld [vmem:[%s4630_s4 + $0x50] sm:$0xff]  }
 0x18d   :  { %2644 = vmatmul.mubr.msk.bf16.vlgmr.msra.gmra.mxu1 %vm573_vm11, %v2807_v57  ;;  %v2823_v57 = vld [vmem:[%s4630_s4 + $0xe0] sm:$0xff]  }
 0x18e   :  { %2732 = vmatpush3.bf16.msra.mxu0 %v2812_v62  ;;  %2752 = vmatpush3.bf16.msra.mxu1 %v2813_v1  ;;  %v2827_v62 = vld [vmem:[%s4630_s4 + $0xd8] sm:$0xff]   ;;  %v2828_v1 = vld [vmem:[%s4630_s4 + $0x10] sm:$0xff]  }
 0x18f   :  { %2733 = vmatprep.subr.bf16.mxu0 %v2814_v35  ;;  %2753 = vmatprep.subr.bf16.mxu1 %v2815_v2  ;;  %v2829_v35 = vld [vmem:[%s4630_s4 + $0x98] sm:$0xff]   ;;  %v2830_v2 = vld [vmem:[%s4630_s4 + $0x48] sm:$0xff]  }
 0x192   :  { %2734 = vmatpush3.bf16.msra.mxu0 %v2816_v42  ;;  %2754 = vmatpush3.bf16.msra.mxu1 %v2817_v55  ;;  %v2831_v42 = vld [vmem:[%s4630_s4 + $0xd0] sm:$0xff]   ;;  %v2832_v55 = vld [vmem:[%s4630_s4 + $0x8] sm:$0xff]  }
 0x193   :  { %2735 = vmatprep.subr.bf16.mxu0 %v2818_v19  ;;  %2755 = vmatprep.subr.bf16.mxu1 %v2819_v49  ;;  %v2833_v19 = vld [vmem:[%s4630_s4 + $0x90] sm:$0xff]   ;;  %v2834_v49 = vld [vmem:[%s4630_s4 + $0x40] sm:$0xff]  }
 0x196   :  { %2736 = vmatpush3.bf16.msra.mxu0 %v2820_v12  ;;  %2756 = vmatpush3.bf16.msra.mxu1 %v2821_v27  ;;  %v2835_v12 = vld [vmem:[%s4630_s4 + $0xc8] sm:$0xff]   ;;  %v2836_v27 = vld [vmem:[%s4630_s4] sm:$0xff]  }
 0x197   :  { %2737 = vmatprep.subr.bf16.mxu0 %v2822_v18  ;;  %2757 = vmatprep.subr.bf16.mxu1 %v2823_v57  ;;  %v2837_v18 = vld [vmem:[%s4630_s4 + $0x88] sm:$0xff]   ;;  %v2838_v57 = vld [vmem:[%s4630_s4 + $0xc0] sm:$0xff]  }
 0x19a   :  { %2738 = vmatpush3.bf16.msra.mxu0 %v2824_v3  ;;  %2758 = vmatpush3.bf16.msra.mxu1 %v2825_v44  ;;  %v4737_v3 = vmov 0   ;;  %v2839_v44 = vld [vmem:[%s4630_s4 + $0x80] sm:$0xff]   ;;  %s2930_s4 = smov 120  }
 0x19b   :  { %2739 = vmatprep.subr.bf16.mxu0 %v2826_v26  ;;  %2759 = vmatprep.subr.bf16.mxu1 %v2827_v62  ;;  %v744_v26 = vld [vmem:[%s4629_s3 + $0x8] sm:$0xff] }
 0x19c   :  { %748 = vperm.xlu1 %2790, %v744_v26  }
 0x19e   :  { %2740 = vmatpush3.bf16.msra.mxu0 %v2828_v1  ;;  %2760 = vmatpush3.bf16.msra.mxu1 %v2829_v35 }
 0x19f   :  { %2741 = vmatprep.subr.bf16.mxu0 %v2830_v2  ;;  %2761 = vmatprep.subr.bf16.mxu1 %v2831_v42 }
 0x1a2   :  { %2742 = vmatpush3.bf16.msra.mxu0 %v2832_v55  ;;  %2762 = vmatpush3.bf16.msra.mxu1 %v2833_v19 }
 0x1a3   :  { %2743 = vmatprep.subr.bf16.mxu0 %v2834_v49  ;;  %2763 = vmatprep.subr.bf16.mxu1 %v2835_v12 }
 0x1a6   :  { %2744 = vmatpush3.bf16.msra.mxu0 %v2836_v27  ;;  %2764 = vmatpush3.bf16.msra.mxu1 %v2837_v18 }
 0x1a7   :  { %1184 = vmatprep.subr.bf16.mxu0 %v4737_v3  ;;  %2765 = vmatprep.subr.bf16.mxu1 %v2838_v57 }
 0x1aa   :  { %2766 = vmatpush3.bf16.msra.mxu1 %v2839_v44 }
 0x217   :  { %v749_v10 = vpop.permute.xlu1 %748 }
 0x249   :  { %v624_v62 = vpop.f32.mrf.mxu0 }
 0x24b   :  { %v626_v1 = vpop.f32.mrf.mxu0 }
 0x24d   :  { %v628_v35 = vpop.f32.mrf.mxu0  ;;  %v667_v2 = vpop.f32.mrf.mxu1 }
 0x24e   :  { %v676_v49 = vpack.c.bf16 %v628_v35, %v624_v62 }
 0x24f   :  { %v630_v42 = vpop.f32.mrf.mxu0  ;;  %v669_v55 = vpop.f32.mrf.mxu1 }
 0x250   :  { %v677_v19 = vpack.c.bf16 %v630_v42, %v626_v1 }
 0x251   :  { %v671_v12 = vpop.f32.mrf.mxu1 }
 0x252   :  { %980 = vmatprep.mubr.bf16.mxu0 %v677_v19  ;;  %v678_v57 = vpack.c.bf16 %v671_v12, %v667_v2 }
 0x253   :  { %v673_v27 = vpop.f32.mrf.mxu1  ;;  %981 = vmatmul.mubr.bf16.vlgmr.msra.gmra.mxu0 %v676_v49  ;;  %v754_v49 = vpop.permute.xlu0 %753 }
 0x254   :  { %v679_v18 = vpack.c.bf16 %v673_v27, %v669_v55 }
 0x256   :  { %1021 = vmatprep.mubr.bf16.mxu1 %v679_v18 }
 0x257   :  { %1022 = vmatmul.mubr.bf16.vlgmr.msra.gmra.mxu1 %v678_v57 }
 0x258   :  { %1452 = vmatprep.mubr.bf16.mxu1 %v4737_v3 }
 0x313   :  { %v2745_v44 = vpop.f32.mrf.mxu0 }
 0x315   :  { %v2746_v26 = vpop.f32.mrf.mxu0 }
 0x316   :  { %v2747_v16 = vadd.f32 %v2746_v26, %v2745_v44  ;;  %v1160_v44 = vld [vmem:[%s4629_s3 + $0x20] sm:$0xff] }
 0x317   :  { %v2748_v17 = vpop.f32.mrf.mxu0  ;;  %v2767_v61 = vpop.f32.mrf.mxu1  ;;  %v2846_v26 = vld [vmem:[%s4631_s5 + $0xc0] ss:$16 sps:$4 sm:$0xff]  }
 0x318   :  { %v983_v1 = vadd.f32 %v2747_v16, %v749_v10  ;;  %v2845_v16 = vld [vmem:[%s4631_s5 + $0xe4] ss:$16 sps:$4 sm:$0xff]  }
 0x319   :  { %v2749_v47 = vpop.f32.mrf.mxu0  ;;  %v2768_v46 = vpop.f32.mrf.mxu1  ;;  %v2848_v10 = vld [vmem:[%s4631_s5 + $0xc4] ss:$16 sps:$4 sm:$0xff]   ;;  %1420 = vmatprep.subr.bf16.mxu1 %v2845_v16 }
 0x31a   :  { %v2750_v62 = vadd.f32 %v2749_v47, %v2748_v17  ;;  %v2769_v35 = vadd.f32 %v2768_v46, %v2767_v61  ;;  %v2840_v47 = vld [vmem:[%s4628_s2 + $0x44] ss:$8 sps:$4 sm:$0xff]   ;;  %v1159_v61 = vld [vmem:[%s4629_s3 + $0x18] sm:$0xff]  ;;  %v2843_v17 = vld [vmem:[%s4631_s5 + $0xe0] ss:$16 sps:$4 sm:$0xff]  }
 0x31b   :  { %v2770_v42 = vpop.f32.mrf.mxu1  ;;  %2680 = vmatprep.mubr.msk.bf16.mxu0 %vm1180_vm12, %v2840_v47  ;;  %1421 = vmatpush1.bf16.msra.mxu1 %v2843_v17 }
 0x31c   :  { %v1024_v19 = vadd.f32 %v2769_v35, %v983_v1  ;;  %v986_v2 = vadd.f32 %v2750_v62, %v754_v49  ;;  %1422 = vmatprep.subr.bf16.mxu1 %v2848_v10  ;;  %v2851_v1 = vld [vmem:[%s4631_s5 + $0xa4] ss:$16 sps:$4 sm:$0xff]   ;;  %v2849_v62 = vld [vmem:[%s4631_s5 + $0xa0] ss:$16 sps:$4 sm:$0xff]  }
 0x31d   :  { %v2771_v55 = vpop.f32.mrf.mxu1  ;;  %v2854_v35 = vld [vmem:[%s4631_s5 + $0x84] ss:$16 sps:$4 sm:$0xff]   ;;  %v2855_v49 = vld [vmem:[%s4631_s5 + $0x60] ss:$16 sps:$4 sm:$0xff]  }
 0x31e   :  { %v3593_v12 = vmax.f32 %v1024_v19, 0.0  ;;  %v2772_v27 = vadd.f32 %v2771_v55, %v2770_v42  ;;  %v2852_v42 = vld [vmem:[%s4631_s5 + $0x80] ss:$16 sps:$4 sm:$0xff]   ;;  %v2857_v19 = vld [vmem:[%s4631_s5 + $0x64] ss:$16 sps:$4 sm:$0xff]  }
 0x31f   :  { %1423 = vmatpush1.bf16.msra.mxu1 %v2846_v26  ;;  %v2860_v55 = vld [vmem:[%s4631_s5 + $0x44] ss:$16 sps:$4 sm:$0xff]  }
 0x320   :  { %v1027_v18 = vadd.f32 %v2772_v27, %v986_v2  ;;  %1106 = vrot.lane.b32.xlu1 %v3593_v12, %s2930_s4  ;;  %1424 = vmatprep.subr.bf16.mxu1 %v2851_v1  ;;  %v2858_v2 = vld [vmem:[%s4631_s5 + $0x40] ss:$16 sps:$4 sm:$0xff]  }
 0x321   :  { %v36_v27 = vld [vmem:[%s4632_s6 + $0x20] sm:$0xff] }
 0x322   :  { %v3596_v57 = vmax.f32 %v1027_v18, 0.0  ;;  %v1113_v47 = vrot.slane %v36_v27, %v3136_v63 }
 0x323   :  { %1425 = vmatpush1.bf16.msra.mxu1 %v2849_v62 }
 0x324   :  { %1108 = vrot.lane.b32.xlu0 %v3596_v57, %s2930_s4  ;;  %1094 = vrot.lane.b32.xlu1 %v3593_v12, %s2931_s15 }
 0x325   :  { %1426 = vmatprep.subr.bf16.mxu1 %v2854_v35 }
 0x327   :  { %1427 = vmatpush1.bf16.msra.mxu1 %v2852_v42 }
 0x328   :  { %1096 = vrot.lane.b32.xlu0 %v3596_v57, %s2931_s15  ;;  %1082 = vrot.lane.b32.xlu1 %v3593_v12, %s2924_s26 }
 0x329   :  { %1428 = vmatprep.subr.bf16.mxu1 %v2857_v19  ;;  %v1089_v19 = vrot.slane %v36_v27, %v3156_v4 }
 0x32b   :  { %1429 = vmatpush1.bf16.msra.mxu1 %v2855_v49 }
 0x32c   :  { %1084 = vrot.lane.b32.xlu0 %v3596_v57, %s2924_s26  ;;  %1068 = vrot.lane.b32.xlu1 %v3593_v12, %s2927_s29 }
 0x32d   :  { %1430 = vmatprep.subr.bf16.mxu1 %v2860_v55 }
 0x32f   :  { %1431 = vmatpush1.bf16.msra.mxu1 %v2858_v2 }
 0x330   :  { %1070 = vrot.lane.b32.xlu0 %v3596_v57, %s2927_s29  ;;  %1056 = vrot.lane.b32.xlu1 %v3593_v12, %s2932_s16 }
 0x334   :  { %1058 = vrot.lane.b32.xlu0 %v3596_v57, %s2932_s16  ;;  %1044 = vrot.lane.b32.xlu1 %v3593_v12, %s2933_s17 }
 0x338   :  { %1046 = vrot.lane.b32.xlu0 %v3596_v57, %s2933_s17  ;;  %1032 = vrot.lane.b32.xlu1 %v3593_v12, %s2934_s18 }
 0x33c   :  { %1034 = vrot.lane.b32.xlu0 %v3596_v57, %s2934_s18  ;;  %1118 = vrot.lane.b32.xlu1 %v3593_v12, %s2935_s21 }
 0x340   :  { %1120 = vrot.lane.b32.xlu0 %v3596_v57, %s2935_s21  ;;  %1163 = vperm.xlu1 %2790, %v1159_v61  }
 0x344   :  { %1168 = vperm.xlu0 %2789, %v1160_v44   ;;  %v1101_v44 = vrot.slane %v36_v27, %v3166_v7 }
 0x392   :  { %v1107_v18 = vpop.permute.xlu1 %1106 }
 0x393   :  { %v1114_v16 = vmul.f32 %v1113_v47, %v1107_v18 }
 0x396   :  { %v1109_v61 = vpop.permute.xlu0 %1108  ;;  %v1095_v17 = vpop.permute.xlu1 %1094 }
 0x397   :  { %v1115_v10 = vmul.f32 %v1113_v47, %v1109_v61  ;;  %v1102_v35 = vmul.f32 %v1101_v44, %v1095_v17  ;;  %v1075_v61 = vrot.slane %v36_v27, %v3200_v21  ;;  %v1051_v21 = vrot.slane %v36_v27, %v3299_v25  ;;  %v2677_v25 = vld [vmem:[%s4632_s6 + $0x48] ss:$0 sm:$0xff] }
 0x399   :  { %v1157_v26 = vpack.c.bf16 %v1115_v10, %v1114_v16  ;;  %v1063_v10 = vrot.slane %v36_v27, %v3184_v13 }
 0x39a   :  { %v1097_v1 = vpop.permute.xlu0 %1096  ;;  %v1083_v62 = vpop.permute.xlu1 %1082 }
 0x39b   :  { %v1103_v42 = vmul.f32 %v1101_v44, %v1097_v1  ;;  %1185 = vmatpush1.bf16.msra.mxu0 %v1157_v26  ;;  %v1090_v63 = vmul.f32 %v1089_v19, %v1083_v62  ;;  %v4738_v44 = vpack.c.bf16 %v3596_v57, %v3593_v12  ;;  %v1039_v12 = vrot.slane %v36_v27, %v3225_v32  ;;  %v2842_v27 = vld [vmem:[%s4628_s2 + $0x40] ss:$8 sps:$4 sm:$0xff]  }
 0x39c   :  { %1186 = vmatprep.subr.bf16.mxu0 %v4737_v3 }
 0x39d   :  { %v1156_v49 = vpack.c.bf16 %v1103_v42, %v1102_v35 }
 0x39e   :  { %v1085_v55 = vpop.permute.xlu0 %1084  ;;  %v1069_v2 = vpop.permute.xlu1 %1068 }
 0x39f   :  { %v1091_v46 = vmul.f32 %v1089_v19, %v1085_v55  ;;  %1187 = vmatpush1.bf16.msra.mxu0 %v1156_v49  ;;  %v1076_v16 = vmul.f32 %v1075_v61, %v1069_v2 }
 0x3a0   :  { %1188 = vmatprep.subr.bf16.mxu0 %v4737_v3 }
 0x3a1   :  { %v1155_v18 = vpack.c.bf16 %v1091_v46, %v1090_v63 }
 0x3a2   :  { %v1071_v7 = vpop.permute.xlu0 %1070  ;;  %v1057_v47 = vpop.permute.xlu1 %1056 }
 0x3a3   :  { %1189 = vmatpush1.bf16.msra.mxu0 %v1155_v18  ;;  %v1077_v4 = vmul.f32 %v1075_v61, %v1071_v7  ;;  %v1064_v35 = vmul.f32 %v1063_v10, %v1057_v47 }
 0x3a4   :  { %1190 = vmatprep.subr.bf16.mxu0 %v4737_v3 }
 0x3a5   :  { %v1153_v46 = vpack.c.bf16 %v1077_v4, %v1076_v16  ;;  %v2861_v16 = vld [vmem:[%s4631_s5 + $0x20] ss:$16 sps:$4 sm:$0xff]  }
 0x3a6   :  { %v1059_v17 = vpop.permute.xlu0 %1058  ;;  %v1045_v26 = vpop.permute.xlu1 %1044 }
 0x3a7   :  { %1191 = vmatpush1.bf16.msra.mxu0 %v4738_v44  ;;  %v1065_v1 = vmul.f32 %v1063_v10, %v1059_v17  ;;  %v1052_v55 = vmul.f32 %v1051_v21, %v1045_v26  ;;  %v2863_v17 = vld [vmem:[%s4631_s5 + $0x24] ss:$16 sps:$4 sm:$0xff]   ;;  %v2864_v44 = vld [vmem:[%s4631_s5] ss:$16 sps:$4 sm:$0xff]   ;;  %v2869_v26 = vld [vmem:[%s4631_s5 + $0xec] ss:$16 sps:$4 sm:$0xff]  }
 0x3a8   :  { %1192 = vmatprep.subr.bf16.mxu0 %v4737_v3  ;;  %1432 = vmatprep.subr.bf16.mxu1 %v2863_v17  ;;  %v2866_v10 = vld [vmem:[%s4631_s5 + $0x4] ss:$16 sps:$4 sm:$0xff]   ;;  %v2887_v17 = vld [vmem:[%s4631_s5 + $0x2c] ss:$16 sps:$4 sm:$0xff]  }
 0x3a9   :  { %v1152_v42 = vpack.c.bf16 %v1065_v1, %v1064_v35  ;;  %1433 = vmatpush1.bf16.msra.mxu1 %v2861_v16  ;;  %v2885_v16 = vld [vmem:[%s4631_s5 + $0x28] ss:$16 sps:$4 sm:$0xff]  }
 0x3aa   :  { %v1047_v62 = vpop.permute.xlu0 %1046  ;;  %v1033_v49 = vpop.permute.xlu1 %1032  ;;  %1434 = vmatprep.subr.bf16.mxu1 %v2866_v10  ;;  %v2890_v10 = vld [vmem:[%s4631_s5 + $0xc] ss:$16 sps:$4 sm:$0xff]  }
 0x3ab   :  { %1193 = vmatpush1.bf16.msra.mxu0 %v1153_v46  ;;  %v1053_v19 = vmul.f32 %v1051_v21, %v1047_v62  ;;  %v1040_v18 = vmul.f32 %v1039_v12, %v1033_v49 }
 0x3ac   :  { %1194 = vmatprep.subr.bf16.mxu0 %v4737_v3 }
 0x3ad   :  { %v1151_v57 = vpack.c.bf16 %v1053_v19, %v1052_v55  ;;  %1435 = vmatpush1.bf16.msra.mxu1 %v2864_v44  ;;  %v2888_v44 = vld [vmem:[%s4631_s5 + $0x8] ss:$16 sps:$4 sm:$0xff]  }
 0x3ae   :  { %v1035_v13 = vpop.permute.xlu0 %1034  ;;  %v1119_v7 = vpop.permute.xlu1 %1118  ;;  %1463 = vmatprep.subr.bf16.mxu1 %v2869_v26 }
 0x3af   :  { %1195 = vmatpush1.bf16.msra.mxu0 %v1152_v42  ;;  %v1041_v2 = vmul.f32 %v1039_v12, %v1035_v13  ;;  %v1126_v4 = vmul.f32 %v2677_v25, %v1119_v7  ;;  %v2867_v12 = vld [vmem:[%s4631_s5 + $0xe8] ss:$16 sps:$4 sm:$0xff]   ;;  %v2878_v7 = vld [vmem:[%s4631_s5 + $0x8c] ss:$16 sps:$4 sm:$0xff]  }
 0x3b0   :  { %1196 = vmatprep.subr.bf16.mxu0 %v4737_v3 }
 0x3b1   :  { %v1150_v47 = vpack.c.bf16 %v1041_v2, %v1040_v18  ;;  %v2872_v2 = vld [vmem:[%s4631_s5 + $0xcc] ss:$16 sps:$4 sm:$0xff]  }
 0x3b2   :  { %v1121_v63 = vpop.permute.xlu0 %1120  ;;  %v2875_v18 = vld [vmem:[%s4631_s5 + $0xac] ss:$16 sps:$4 sm:$0xff]  }
 0x3b3   :  { %1197 = vmatpush1.bf16.msra.mxu0 %v1151_v57  ;;  %v1127_v61 = vmul.f32 %v2677_v25, %v1121_v63  ;;  %v2870_v63 = vld [vmem:[%s4631_s5 + $0xc8] ss:$16 sps:$4 sm:$0xff]  }
 0x3b4   :  { %1198 = vmatprep.subr.bf16.mxu0 %v4737_v3  ;;  %v2873_v25 = vld [vmem:[%s4631_s5 + $0xa8] ss:$16 sps:$4 sm:$0xff]  }
 0x3b5   :  { %v1158_v32 = vpack.c.bf16 %v1127_v61, %v1126_v4  ;;  %v2881_v61 = vld [vmem:[%s4631_s5 + $0x6c] ss:$16 sps:$4 sm:$0xff]   ;;  %v2879_v4 = vld [vmem:[%s4631_s5 + $0x68] ss:$16 sps:$4 sm:$0xff]  }
 0x3b7   :  { %1199 = vmatpush1.bf16.msra.mxu0 %v1150_v47  ;;  %v2876_v47 = vld [vmem:[%s4631_s5 + $0x88] ss:$16 sps:$4 sm:$0xff]  }
 0x3b8   :  { %1214 = vmatprep.subr.bf16.mxu0 %v4737_v3 }
 0x3bb   :  { %1215 = vmatpush2.bf16.msra.mxu0 %v1158_v32  ;;  %v1164_v1 = vpop.permute.xlu1 %1163  ;;  %v2884_v32 = vld [vmem:[%s4631_s5 + $0x4c] ss:$16 sps:$4 sm:$0xff]  }
 0x3be   :  { %1217 = vmatmul.mubr.bf16.vlgmr.msra.gmra.mxu0 %v2842_v27  ;;  %v2882_v27 = vld [vmem:[%s4631_s5 + $0x48] ss:$16 sps:$4 sm:$0xff]  }
 0x3bf   :  { %v1169_v21 = vpop.permute.xlu0 %1168 }
 0x47e   :  { %v1218_v46 = vpop.f32.mrf.mxu0 }
 0x47f   :  { %v1219_v35 = vadd.f32 %v1218_v46, %v1164_v1 }
 0x480   :  { %v1220_v62 = vpop.f32.mrf.mxu0 }
 0x481   :  { %v1225_v13 = vmax.f32 %v1219_v35, 0.0 }
 0x482   :  { %v1221_v42 = vpop.f32.mrf.mxu0 }
 0x483   :  { %v1222_v19 = vadd.f32 %v1221_v42, %v1169_v21 }
 0x484   :  { %v1223_v49 = vpop.f32.mrf.mxu0 }
 0x485   :  { %v1226_v55 = vmax.f32 %v1222_v19, 0.0 }
 0x487   :  { %v1227_v57 = vpack.c.bf16 %v1226_v55, %v1225_v13 }
 0x489   :  { %1453 = vmatmul.mubr.bf16.vlgmr.msra.gmra.mxu1 %v1227_v57 }
 0x48a   :  { %1464 = vmatpush1.bf16.msra.mxu1 %v2867_v12  ;;  %1495 = vmatprep.mubr.bf16.mxu1 %v4737_v3  ;;  %v3896_v12 = vld [vmem:[%s4628_s2 + $0x50] sm:$0xff] }
 0x48b   :  { %1465 = vmatprep.subr.bf16.mxu1 %v2872_v2  ;;  %4743 = vst [vmem:[#allocation52_spill] sm:$0xff] %v3896_v12 }
 0x48e   :  { %1466 = vmatpush1.bf16.msra.mxu1 %v2870_v63 }
 0x48f   :  { %1467 = vmatprep.subr.bf16.mxu1 %v2875_v18 }
 0x492   :  { %1468 = vmatpush1.bf16.msra.mxu1 %v2873_v25 }
 0x493   :  { %1469 = vmatprep.subr.bf16.mxu1 %v2878_v7  ;;  %v1943_v7 = vld [vmem:[%s4629_s3 + $0x28] sm:$0xff] }
 0x496   :  { %1470 = vmatpush1.bf16.msra.mxu1 %v2876_v47 }
 0x497   :  { %1471 = vmatprep.subr.bf16.mxu1 %v2881_v61 }
 0x49a   :  { %1472 = vmatpush1.bf16.msra.mxu1 %v2879_v4 }
 0x49b   :  { %1473 = vmatprep.subr.bf16.mxu1 %v2884_v32 }
 0x49e   :  { %1474 = vmatpush1.bf16.msra.mxu1 %v2882_v27 }
 0x49f   :  { %1475 = vmatprep.subr.bf16.mxu1 %v2887_v17 }
 0x4a2   :  { %1476 = vmatpush1.bf16.msra.mxu1 %v2885_v16 }
 0x4a3   :  { %1477 = vmatprep.subr.bf16.mxu1 %v2890_v10 }
 0x4a6   :  { %1478 = vmatpush1.bf16.msra.mxu1 %v2888_v44 }
 0x4a9   :  { %1496 = vmatmul.mubr.bf16.vlgmr.msra.gmra.mxu1 %v1227_v57  ;;  %v2714_v57 = vcombine.high %v3896_v12, %v3896_v12 }
 0x4ab   :  { %2715 = vmatprep.mubr.msk.bf16.mxu0 %vm1180_vm12, %v2714_v57  ;;  %2716 = vmatprep.mubr.msk.bf16.mxu1 %vm1180_vm12, %v2714_v57 }
 0x549   :  { %v3753_v26 = vpop.f32.mrf.mxu1 }
 0x54a   :  { %1754 = vrot.lane.b32.xlu1 %v3753_v26, %s2925_s27 }
 0x54b   :  { %v3757_v46 = vpop.f32.mrf.mxu1 }
 0x54d   :  { %v3759_v1 = vpop.f32.mrf.mxu1 }
 0x54e   :  { %1714 = vrot.lane.b32.xlu1 %v3753_v26, %s2923_s25  ;;  %1756 = vrot.lane.b32.xlu0 %v3759_v1, %s2925_s27 }
 0x54f   :  { %v3765_v62 = vpop.f32.mrf.mxu1 }
 0x552   :  { %1674 = vrot.lane.b32.xlu1 %v3753_v26, %s2924_s26  ;;  %1716 = vrot.lane.b32.xlu0 %v3759_v1, %s2923_s25 }
 0x556   :  { %1626 = vrot.lane.b32.xlu1 %v3753_v26, %s2927_s29  ;;  %1676 = vrot.lane.b32.xlu0 %v3759_v1, %s2924_s26 }
 0x55a   :  { %1586 = vrot.lane.b32.xlu1 %v3753_v26, %s2926_s28  ;;  %1628 = vrot.lane.b32.xlu0 %v3759_v1, %s2927_s29 }
 0x55e   :  { %1546 = vrot.lane.b32.xlu1 %v3753_v26, %s2929_s8  ;;  %1588 = vrot.lane.b32.xlu0 %v3759_v1, %s2926_s28 }
 0x562   :  { %1506 = vrot.lane.b32.xlu1 %v3753_v26, %s2928_s30  ;;  %1548 = vrot.lane.b32.xlu0 %v3759_v1, %s2929_s8 }
 0x566   :  { %1758 = vrot.lane.b32.xlu1 %v3757_v46, %s2925_s27  ;;  %1508 = vrot.lane.b32.xlu0 %v3759_v1, %s2928_s30 }
 0x569   :  { %v3793_v21 = vpop.f32.mrf.mxu1 }
 0x56a   :  { %4739 = vst [vmem:[#allocation48_spill] sm:$0xff] %v3793_v21  ;;  %1718 = vrot.lane.b32.xlu1 %v3757_v46, %s2923_s25  ;;  %1760 = vrot.lane.b32.xlu0 %v3765_v62, %s2925_s27 }
 0x56b   :  { %v3799_v42 = vpop.f32.mrf.mxu1 }
 0x56c   :  { %4740 = vst [vmem:[#allocation49_spill] sm:$0xff] %v3799_v42 }
 0x56d   :  { %v3801_v19 = vpop.f32.mrf.mxu1 }
 0x56e   :  { %4741 = vst [vmem:[#allocation50_spill] sm:$0xff] %v3801_v19  ;;  %1678 = vrot.lane.b32.xlu1 %v3757_v46, %s2924_s26  ;;  %1720 = vrot.lane.b32.xlu0 %v3765_v62, %s2923_s25 }
 0x56f   :  { %v3865_v13 = vpop.f32.mrf.mxu1 }
 0x570   :  { %4742 = vst [vmem:[#allocation51_spill] sm:$0xff] %v3865_v13 }
 0x572   :  { %1630 = vrot.lane.b32.xlu1 %v3757_v46, %s2927_s29  ;;  %1680 = vrot.lane.b32.xlu0 %v3765_v62, %s2924_s26 }
 0x576   :  { %1590 = vrot.lane.b32.xlu1 %v3757_v46, %s2926_s28  ;;  %1632 = vrot.lane.b32.xlu0 %v3765_v62, %s2927_s29 }
 0x57a   :  { %1550 = vrot.lane.b32.xlu1 %v3757_v46, %s2929_s8  ;;  %1592 = vrot.lane.b32.xlu0 %v3765_v62, %s2926_s28 }
 0x57e   :  { %1510 = vrot.lane.b32.xlu1 %v3757_v46, %s2928_s30  ;;  %1552 = vrot.lane.b32.xlu0 %v3765_v62, %s2929_s8 }
 0x582   :  { %1798 = vrot.lane.b32.xlu1 %v3757_v46, %s2922_s24  ;;  %1512 = vrot.lane.b32.xlu0 %v3765_v62, %s2928_s30 }
 0x586   :  { %1800 = vrot.lane.b32.xlu0 %v3765_v62, %s2922_s24  ;;  %1762 = vrot.lane.b32.xlu1 %v3793_v21, %s2925_s27 }
 0x58a   :  { %1722 = vrot.lane.b32.xlu1 %v3793_v21, %s2923_s25  ;;  %1764 = vrot.lane.b32.xlu0 %v3801_v19, %s2925_s27 }
 0x58e   :  { %1682 = vrot.lane.b32.xlu1 %v3793_v21, %s2924_s26  ;;  %1724 = vrot.lane.b32.xlu0 %v3801_v19, %s2923_s25 }
 0x592   :  { %1634 = vrot.lane.b32.xlu1 %v3793_v21, %s2927_s29  ;;  %1684 = vrot.lane.b32.xlu0 %v3801_v19, %s2924_s26 }
 0x596   :  { %1594 = vrot.lane.b32.xlu1 %v3793_v21, %s2926_s28  ;;  %1636 = vrot.lane.b32.xlu0 %v3801_v19, %s2927_s29 }
 0x59a   :  { %1554 = vrot.lane.b32.xlu1 %v3793_v21, %s2929_s8  ;;  %1596 = vrot.lane.b32.xlu0 %v3801_v19, %s2926_s28 }
 0x59e   :  { %1514 = vrot.lane.b32.xlu1 %v3793_v21, %s2928_s30  ;;  %1556 = vrot.lane.b32.xlu0 %v3801_v19, %s2929_s8 }
 0x5a2   :  { %1802 = vrot.lane.b32.xlu1 %v3793_v21, %s2922_s24  ;;  %1516 = vrot.lane.b32.xlu0 %v3801_v19, %s2928_s30 }
 0x5a6   :  { %1766 = vrot.lane.b32.xlu1 %v3799_v42, %s2925_s27  ;;  %1804 = vrot.lane.b32.xlu0 %v3801_v19, %s2922_s24 }
 0x5aa   :  { %1726 = vrot.lane.b32.xlu1 %v3799_v42, %s2923_s25  ;;  %1768 = vrot.lane.b32.xlu0 %v3865_v13, %s2925_s27 }
 0x5ae   :  { %1686 = vrot.lane.b32.xlu1 %v3799_v42, %s2924_s26  ;;  %1728 = vrot.lane.b32.xlu0 %v3865_v13, %s2923_s25 }
 0x5b2   :  { %1638 = vrot.lane.b32.xlu1 %v3799_v42, %s2927_s29  ;;  %1688 = vrot.lane.b32.xlu0 %v3865_v13, %s2924_s26 }
 0x5b6   :  { %1598 = vrot.lane.b32.xlu1 %v3799_v42, %s2926_s28  ;;  %1640 = vrot.lane.b32.xlu0 %v3865_v13, %s2927_s29 }
 0x5ba   :  { %1558 = vrot.lane.b32.xlu1 %v3799_v42, %s2929_s8  ;;  %1600 = vrot.lane.b32.xlu0 %v3865_v13, %s2926_s28 }
 0x5bc   :  { %v3887_v55 = vpop.permute.xlu1 %1754 }
 0x5be   :  { %1518 = vrot.lane.b32.xlu1 %v3799_v42, %s2928_s30  ;;  %1560 = vrot.lane.b32.xlu0 %v3865_v13, %s2929_s8 }
 0x5c0   :  { %v3900_v2 = vpop.permute.xlu1 %1714  ;;  %v3902_v63 = vpop.permute.xlu0 %1756 }
 0x5c2   :  { %1794 = vrot.lane.b32.xlu1 %v3753_v26, %s2922_s24  ;;  %1520 = vrot.lane.b32.xlu0 %v3865_v13, %s2928_s30 }
 0x5c4   :  { %v3910_v18 = vpop.permute.xlu1 %1674  ;;  %v3912_v25 = vpop.permute.xlu0 %1716 }
 0x5c6   :  { %1806 = vrot.lane.b32.xlu1 %v3799_v42, %s2922_s24  ;;  %1796 = vrot.lane.b32.xlu0 %v3759_v1, %s2922_s24 }
 0x5c8   :  { %v3921_v47 = vpop.permute.xlu1 %1626  ;;  %v3923_v61 = vpop.permute.xlu0 %1676 }
 0x5ca   :  { %1946 = vperm.xlu1 %2790, %v1943_v7   ;;  %1808 = vrot.lane.b32.xlu0 %v3865_v13, %s2922_s24 }
 0x5cc   :  { %v3927_v4 = vpop.permute.xlu1 %1586  ;;  %v3929_v32 = vpop.permute.xlu0 %1628 }
 0x5d0   :  { %v3931_v27 = vpop.permute.xlu1 %1546  ;;  %v3933_v17 = vpop.permute.xlu0 %1588 }
 0x5d4   :  { %v3935_v16 = vpop.permute.xlu1 %1506  ;;  %v3937_v10 = vpop.permute.xlu0 %1548 }
 0x5d5   :  { %4744 = vst [vmem:[#allocation53_spill] sm:$0xff] %v3935_v16 }
 0x5d8   :  { %v1759_v44 = vpop.permute.xlu1 %1758  ;;  %v3939_v57 = vpop.permute.xlu0 %1508 }
 0x5d9   :  { %4745 = vst [vmem:[#allocation54_spill] sm:$0xff] %v3939_v57  ;;  %v1774_v19 = vsel %vm444_vm4, %v3887_v55, %v1759_v44 }
 0x5dc   :  { %v1719_v49 = vpop.permute.xlu1 %1718  ;;  %v1761_v7 = vpop.permute.xlu0 %1760 }
 0x5dd   :  { %v1775_v28 = vsel %vm444_vm4, %v3902_v63, %v1761_v7 }
 0x5e0   :  { %v1679_v35 = vpop.permute.xlu1 %1678  ;;  %v1721_v59 = vpop.permute.xlu0 %1720 }
 0x5e1   :  { %v1735_v56 = vsel %vm407_vm6, %v3912_v25, %v1721_v59 }
 0x5e4   :  { %v1631_v0 = vpop.permute.xlu1 %1630  ;;  %v1681_v53 = vpop.permute.xlu0 %1680 }
 0x5e8   :  { %v3941_v40 = vpop.permute.xlu1 %1590  ;;  %v1633_v60 = vpop.permute.xlu0 %1632 }
 0x5ec   :  { %v3943_v30 = vpop.permute.xlu1 %1550  ;;  %v3945_v33 = vpop.permute.xlu0 %1592 }
 0x5f0   :  { %v3947_v29 = vpop.permute.xlu1 %1510  ;;  %v3949_v3 = vpop.permute.xlu0 %1552 }
 0x5f4   :  { %v3951_v12 = vpop.permute.xlu1 %1798  ;;  %v3953_v41 = vpop.permute.xlu0 %1512 }
 0x5f5   :  { %4746 = vst [vmem:[#allocation55_spill] sm:$0xff] %v3951_v12 }
 0x5f8   :  { %v3955_v24 = vpop.permute.xlu0 %1800  ;;  %v3957_v11 = vpop.permute.xlu1 %1762 }
 0x5f9   :  { %4747 = vst [vmem:[#allocation56_spill] sm:$0xff] %v3955_v24  ;;  %v1772_v21 = vsel %vm444_vm4, %v1759_v44, %v3957_v11  ;;  %v1782_v24 = vmul.f32 %v1775_v28, %v3233_v36  ;;  %v1778_v44 = vmul.f32 %v1774_v19, %v3233_v36  ;;  %v1734_v28 = vsel %vm407_vm6, %v3900_v2, %v1719_v49 }
 0x5fa   :  { %v1779_v57 = vmul.f32 %v1772_v21, %v3237_v37  ;;  %v1742_v21 = vmul.f32 %v1735_v56, %v3209_v23  ;;  %v1695_v19 = vsel %vm370_vm5, %v3923_v61, %v1681_v53  ;;  %v1738_v58 = vmul.f32 %v1734_v28, %v3209_v23 }
 0x5fb   :  { %v1935_v5 = vpack.c.bf16 %v1782_v24, %v1778_v44  ;;  %v1694_v56 = vsel %vm370_vm5, %v3910_v18, %v1679_v35  ;;  %v1702_v44 = vmul.f32 %v1695_v19, %v3278_v6  ;;  %v1646_v19 = vsel %vm329_vm8, %v3921_v47, %v1631_v0 }
 0x5fc   :  { %v3968_v15 = vpop.permute.xlu1 %1722  ;;  %v3970_v12 = vpop.permute.xlu0 %1764 }
 0x5fd   :  { %v1773_v54 = vsel %vm444_vm4, %v1761_v7, %v3970_v12  ;;  %v1732_v39 = vsel %vm407_vm6, %v1719_v49, %v3968_v15 }
 0x5fe   :  { %v1783_v16 = vmul.f32 %v1773_v54, %v3237_v37  ;;  %v4748_v37 = vld [vmem:[#allocation10_spill] sm:$0xff] }
 0x5ff   :  { %v1739_v36 = vmul.f32 %v1732_v39, %v4748_v37  ;;  %v1931_v39 = vpack.c.bf16 %v1742_v21, %v1738_v58 }
 0x600   :  { %v3988_v13 = vpop.permute.xlu1 %1682  ;;  %v3990_v7 = vpop.permute.xlu0 %1724  ;;  %v1936_v42 = vpack.c.bf16 %v1783_v16, %v1779_v57 }
 0x601   :  { %v1733_v54 = vsel %vm407_vm6, %v1721_v59, %v3990_v7  ;;  %v1692_v24 = vsel %vm370_vm5, %v1679_v35, %v3988_v13  ;;  %v1647_v35 = vsel %vm329_vm8, %v3929_v32, %v1633_v60 }
 0x602   :  { %v1743_v49 = vmul.f32 %v1733_v54, %v4748_v37  ;;  %1958 = vmatprep.subr.bf16.mxu0 %v1936_v42  ;;  %v1699_v28 = vmul.f32 %v1692_v24, %v3282_v9  ;;  %v1698_v54 = vmul.f32 %v1694_v56, %v3278_v6  ;;  %v1655_v56 = vmul.f32 %v1647_v35, %v3244_v38 }
 0x603   :  { %1959 = vmatpush1.bf16.msra.mxu0 %v1935_v5  ;;  %v1923_v35 = vpack.c.bf16 %v3759_v1, %v3753_v26 }
 0x604   :  { %v4008_v59 = vpop.permute.xlu1 %1634  ;;  %v4010_v16 = vpop.permute.xlu0 %1684  ;;  %v1932_v57 = vpack.c.bf16 %v1743_v49, %v1739_v36  ;;  %v1927_v49 = vpack.c.bf16 %v1702_v44, %v1698_v54 }
 0x605   :  { %v1693_v42 = vsel %vm370_vm5, %v1681_v53, %v4010_v16  ;;  %v1644_v36 = vsel %vm329_vm8, %v1631_v0, %v4008_v59  ;;  %v1651_v0 = vmul.f32 %v1646_v19, %v3244_v38 }
 0x606   :  { %v1703_v5 = vmul.f32 %v1693_v42, %v3282_v9  ;;  %1960 = vmatprep.subr.bf16.mxu0 %v1932_v57  ;;  %v4037_v57 = vmul.f32 %v1644_v36, %v3248_v45 }
 0x607   :  { %1961 = vmatpush1.bf16.msra.mxu0 %v1931_v39  ;;  %v1920_v19 = vpack.c.bf16 %v1655_v56, %v1651_v0 }
 0x608   :  { %v4025_v58 = vpop.permute.xlu1 %1594  ;;  %v4027_v21 = vpop.permute.xlu0 %1636  ;;  %v1928_v53 = vpack.c.bf16 %v1703_v5, %v1699_v28  ;;  %v4749_v28 = vpack.c.bf16 %v3765_v62, %v3757_v46 }
 0x609   :  { %v1645_v24 = vsel %vm329_vm8, %v1633_v60, %v4027_v21  ;;  %v1604_v42 = vsel %vm292_vm7, %v3941_v40, %v4025_v58 }
 0x60a   :  { %v4040_v39 = vmul.f32 %v1645_v24, %v3248_v45  ;;  %1962 = vmatprep.subr.bf16.mxu0 %v1928_v53  ;;  %v4063_v36 = vmul.f32 %v1604_v42, %v3229_v34 }
 0x60b   :  { %1963 = vmatpush1.bf16.msra.mxu0 %v1927_v49 }
 0x60c   :  { %v4049_v44 = vpop.permute.xlu1 %1554  ;;  %1964 = vmatprep.subr.bf16.mxu0 %v4749_v28  ;;  %v4054_v5 = vpop.permute.xlu0 %1596 }
 0x60d   :  { %v1605_v54 = vsel %vm292_vm7, %v3945_v33, %v4054_v5  ;;  %v1564_v46 = vsel %vm255_vm10, %v3943_v30, %v4049_v44 }
 0x60e   :  { %v4066_v53 = vmul.f32 %v1605_v54, %v3229_v34  ;;  %v4083_v24 = vmul.f32 %v1564_v46, %v3452_v50 }
 0x60f   :  { %1965 = vmatpush1.bf16.msra.mxu0 %v1923_v35 }
 0x610   :  { %v4074_v49 = vpop.permute.xlu1 %1514  ;;  %1966 = vmatprep.subr.bf16.mxu0 %v1920_v19  ;;  %v4076_v26 = vpop.permute.xlu0 %1556 }
 0x611   :  { %v1565_v1 = vsel %vm255_vm10, %v3949_v3, %v4076_v26  ;;  %v1524_v42 = vsel %vm218_vm9, %v3947_v29, %v4074_v49 }
 0x612   :  { %v4086_v56 = vmul.f32 %v1565_v1, %v3452_v50  ;;  %v4103_v19 = vmul.f32 %v1524_v42, %v3430_v43 }
 0x614   :  { %v4094_v28 = vpop.permute.xlu1 %1802  ;;  %v4096_v54 = vpop.permute.xlu0 %1516 }
 0x615   :  { %v1525_v35 = vsel %vm218_vm9, %v3953_v41, %v4096_v54 }
 0x616   :  { %v4106_v46 = vmul.f32 %v1525_v35, %v3430_v43 }
 0x618   :  { %v1767_v62 = vpop.permute.xlu1 %1766  ;;  %v4110_v0 = vpop.permute.xlu0 %1804 }
 0x619   :  { %v1770_v60 = vsel %vm444_vm4, %v3957_v11, %v1767_v62  ;;  %v1776_v50 = vsel %vm444_vm4, %v1767_v62, %v3887_v55 }
 0x61a   :  { %v1780_v43 = vmul.f32 %v1770_v60, %v3171_v8  ;;  %v1781_v45 = vmul.f32 %v1776_v50, %v3188_v14 }
 0x61c   :  { %v1727_v34 = vpop.permute.xlu1 %1726  ;;  %v1769_v42 = vpop.permute.xlu0 %1768 }
 0x61d   :  { %v1771_v35 = vsel %vm444_vm4, %v3970_v12, %v1769_v42  ;;  %v1777_v1 = vsel %vm444_vm4, %v1769_v42, %v3902_v63  ;;  %v1730_v55 = vsel %vm407_vm6, %v3968_v15, %v1727_v34  ;;  %v1736_v12 = vsel %vm407_vm6, %v1727_v34, %v3900_v2 }
 0x61e   :  { %v1784_v11 = vmul.f32 %v1771_v35, %v3171_v8  ;;  %v1785_v38 = vmul.f32 %v1777_v1, %v3188_v14  ;;  %v1740_v1 = vmul.f32 %v1730_v55, %v3252_v51  ;;  %v1741_v15 = vmul.f32 %v1736_v12, %v3256_v52 }
 0x61f   :  { %v1606_v35 = vsel %vm292_vm7, %v3927_v4, %v3941_v40 }
 0x620   :  { %v1937_v62 = vpack.c.bf16 %v1784_v11, %v1780_v43  ;;  %v1687_v9 = vpop.permute.xlu1 %1686  ;;  %v1729_v6 = vpop.permute.xlu0 %1728  ;;  %v1938_v63 = vpack.c.bf16 %v1785_v38, %v1781_v45 }
 0x621   :  { %v1731_v50 = vsel %vm407_vm6, %v3990_v7, %v1729_v6  ;;  %v1737_v60 = vsel %vm407_vm6, %v1729_v6, %v3912_v25  ;;  %v1690_v38 = vsel %vm370_vm5, %v3988_v13, %v1687_v9  ;;  %v1696_v45 = vsel %vm370_vm5, %v1687_v9, %v3910_v18 }
 0x622   :  { %v1744_v42 = vmul.f32 %v1731_v50, %v3252_v51  ;;  %v1745_v34 = vmul.f32 %v1737_v60, %v3256_v52  ;;  %1999 = vmatprep.subr.bf16.mxu1 %v1938_v63  ;;  %v1607_v6 = vsel %vm292_vm7, %v3933_v17, %v3945_v33  ;;  %v1700_v18 = vmul.f32 %v1690_v38, %v3197_v20 }
 0x623   :  { %2000 = vmatpush1.bf16.msra.mxu1 %v1937_v62  ;;  %v1701_v33 = vmul.f32 %v1696_v45, %v3204_v22  ;;  %v1615_v12 = vmul.f32 %v1607_v6, %v3222_v31  ;;  %v4751_v45 = vld [vmem:[#allocation19_spill] sm:$0xff] }
 0x624   :  { %v1933_v43 = vpack.c.bf16 %v1744_v42, %v1740_v1  ;;  %v1639_v2 = vpop.permute.xlu1 %1638  ;;  %v1689_v25 = vpop.permute.xlu0 %1688  ;;  %v1934_v7 = vpack.c.bf16 %v1745_v34, %v1741_v15  ;;  %v1567_v1 = vsel %vm255_vm10, %v3937_v10, %v3949_v3  ;;  %v4750_v42 = vld [vmem:[#allocation18_spill] sm:$0xff]  ;;  %v4752_v3 = vld [vmem:[#allocation49_spill] sm:$0xff] }
 0x625   :  { %v1691_v13 = vsel %vm370_vm5, %v4010_v16, %v1689_v25  ;;  %v1697_v9 = vsel %vm370_vm5, %v1689_v25, %v3923_v61  ;;  %v1648_v40 = vsel %vm329_vm8, %v1639_v2, %v3921_v47  ;;  %v1611_v16 = vmul.f32 %v1606_v35, %v3222_v31 }
 0x626   :  { %v1704_v11 = vmul.f32 %v1691_v13, %v3197_v20  ;;  %v1705_v55 = vmul.f32 %v1697_v9, %v3204_v22  ;;  %2001 = vmatprep.subr.bf16.mxu1 %v1934_v7  ;;  %v1566_v61 = vsel %vm255_vm10, %v3931_v27, %v3943_v30  ;;  %v1642_v47 = vsel %vm329_vm8, %v4008_v59, %v1639_v2  ;;  %v4754_v7 = vld [vmem:[#allocation27_spill] sm:$0xff] }
 0x627   :  { %2002 = vmatpush1.bf16.msra.mxu1 %v1933_v43  ;;  %v1650_v34 = vmul.f32 %v1648_v40, %v4750_v42  ;;  %v4753_v43 = vld [vmem:[#allocation51_spill] sm:$0xff]  ;;  %v1571_v59 = vmul.f32 %v1566_v61, %v4754_v7  ;;  %v1916_v2 = vpack.c.bf16 %v1615_v12, %v1611_v16  ;;  %v1575_v13 = vmul.f32 %v1567_v1, %v4754_v7  ;;  %v4759_v1 = vld [vmem:[#allocation22_spill] sm:$0xff] }
 0x628   :  { %v1929_v62 = vpack.c.bf16 %v1704_v11, %v1700_v18  ;;  %v1599_v63 = vpop.permute.xlu1 %1598  ;;  %v1641_v50 = vpop.permute.xlu0 %1640  ;;  %v1930_v60 = vpack.c.bf16 %v1705_v55, %v1701_v33  ;;  %v1926_v25 = vpack.c.bf16 %v4753_v43, %v4752_v3  ;;  %v1653_v9 = vmul.f32 %v1642_v47, %v4751_v45  ;;  %v4756_v55 = vld [vmem:[#allocation54_spill] sm:$0xff]  ;;  %v4757_v16 = vld [vmem:[#allocation23_spill] sm:$0xff]  ;;  %v4763_v43 = vld [vmem:[#allocation56_spill] sm:$0xff] }
 0x629   :  { %v1643_v15 = vsel %vm329_vm8, %v4027_v21, %v1641_v50  ;;  %v1649_v30 = vsel %vm329_vm8, %v1641_v50, %v3929_v32  ;;  %v1608_v21 = vsel %vm292_vm7, %v1599_v63, %v3927_v4  ;;  %v4755_v32 = vld [vmem:[#allocation53_spill] sm:$0xff]  ;;  %v1527_v4 = vsel %vm218_vm9, %v4756_v55, %v3953_v41  ;;  %v4758_v50 = vld [vmem:[#allocation24_spill] sm:$0xff] }
 0x62a   :  { %v1654_v38 = vmul.f32 %v1649_v30, %v4750_v42  ;;  %v1657_v6 = vmul.f32 %v1643_v15, %v4751_v45  ;;  %2003 = vmatprep.subr.bf16.mxu1 %v1930_v60  ;;  %v1526_v35 = vsel %vm218_vm9, %v4755_v32, %v3947_v29  ;;  %v1602_v12 = vsel %vm292_vm7, %v4025_v58, %v1599_v63  ;;  %v4761_v63 = vld [vmem:[#allocation48_spill] sm:$0xff] }
 0x62b   :  { %2004 = vmatpush1.bf16.msra.mxu1 %v1929_v62  ;;  %v1610_v61 = vmul.f32 %v1608_v21, %v4757_v16  ;;  %v1531_v47 = vmul.f32 %v1526_v35, %v4759_v1  ;;  %v1613_v30 = vmul.f32 %v1602_v12, %v4758_v50  ;;  %v4764_v35 = vld [vmem:[#allocation31_spill] sm:$0xff] }
 0x62c   :  { %v1919_v18 = vpack.c.bf16 %v1654_v38, %v1650_v34  ;;  %v1559_v33 = vpop.permute.xlu1 %1558  ;;  %v1601_v11 = vpop.permute.xlu0 %1600  ;;  %2005 = vmatprep.subr.bf16.mxu1 %v1926_v25  ;;  %v1922_v41 = vpack.c.bf16 %v1657_v6, %v1653_v9  ;;  %v1912_v6 = vpack.c.bf16 %v1575_v13, %v1571_v59  ;;  %v1813_v25 = vsel %vm481_vm2, %v4763_v43, %v4110_v0  ;;  %v4765_v13 = vld [vmem:[#allocation43_spill] sm:$0xff] }
 0x62d   :  { %v1603_v29 = vsel %vm292_vm7, %v4054_v5, %v1601_v11  ;;  %v1609_v40 = vsel %vm292_vm7, %v1601_v11, %v3933_v17  ;;  %v1568_v58 = vsel %vm255_vm10, %v1559_v33, %v3931_v27  ;;  %v4760_v5 = vld [vmem:[#allocation50_spill] sm:$0xff]  ;;  %v1535_v17 = vmul.f32 %v1527_v4, %v4759_v1 }
 0x62e   :  { %v1614_v62 = vmul.f32 %v1609_v40, %v4757_v16  ;;  %v1617_v60 = vmul.f32 %v1603_v29, %v4758_v50  ;;  %1967 = vmatpush1.bf16.msra.mxu0 %v1919_v18  ;;  %v4762_v15 = vpack.c.bf16 %v4760_v5, %v4761_v63  ;;  %v1562_v27 = vsel %vm255_vm10, %v4049_v44, %v1559_v33  ;;  %v4767_v33 = vld [vmem:[#allocation55_spill] sm:$0xff]  ;;  %v4769_v5 = vld [vmem:[#allocation40_spill] sm:$0xff] }
 0x62f   :  { %1968 = vmatprep.subr.bf16.mxu0 %v1916_v2  ;;  %v1570_v9 = vmul.f32 %v1568_v58, %v4764_v35  ;;  %v1573_v4 = vmul.f32 %v1562_v27, %v4765_v13 }
 0x630   :  { %2006 = vmatpush1.bf16.msra.mxu1 %v4762_v15  ;;  %v1915_v34 = vpack.c.bf16 %v1614_v62, %v1610_v61  ;;  %v1519_v38 = vpop.permute.xlu1 %1518  ;;  %v1561_v3 = vpop.permute.xlu0 %1560  ;;  %v1918_v11 = vpack.c.bf16 %v1617_v60, %v1613_v30  ;;  %v1908_v61 = vpack.c.bf16 %v1535_v17, %v1531_v47 }
 0x631   :  { %2007 = vmatprep.subr.bf16.mxu1 %v1922_v41  ;;  %v1563_v21 = vsel %vm255_vm10, %v4076_v26, %v1561_v3  ;;  %v1569_v2 = vsel %vm255_vm10, %v1561_v3, %v3937_v10  ;;  %v1528_v44 = vsel %vm218_vm9, %v1519_v38, %v4755_v32  ;;  %v4766_v26 = vpack.c.bf16 %v4040_v39, %v4037_v57  ;;  %v4260_v32 = vld [vmem:[%s4632_s6 + $0x30] ss:$0 sm:$0xff]  ;;  %v4768_v41 = vld [vmem:[#allocation28_spill] sm:$0xff] }
 0x632   :  { %v1574_v59 = vmul.f32 %v1569_v2, %v4764_v35  ;;  %v1577_v18 = vmul.f32 %v1563_v21, %v4765_v13  ;;  %1969 = vmatpush1.bf16.msra.mxu0 %v1915_v34  ;;  %v1812_v10 = vsel %vm481_vm2, %v4767_v33, %v4094_v28  ;;  %v1823_v57 = vmul.f32 %v4260_v32, %v1813_v25  ;;  %v4289_v25 = vld [vmem:[%s4632_s6 + $0x28] ss:$0 sm:$0xff] }
 0x633   :  { %1970 = vmatprep.subr.bf16.mxu0 %v1912_v6  ;;  %v1522_v39 = vsel %vm218_vm9, %v4074_v49, %v1519_v38  ;;  %v1530_v47 = vmul.f32 %v1528_v44, %v4768_v41  ;;  %v1819_v17 = vmul.f32 %v4260_v32, %v1812_v10  ;;  %v4772_v44 = vld [vmem:[#allocation52_spill] sm:$0xff] }
 0x634   :  { %2008 = vmatpush1.bf16.msra.mxu1 %v4766_v26  ;;  %v1911_v12 = vpack.c.bf16 %v1574_v59, %v1570_v9  ;;  %v1795_v29 = vpop.permute.xlu1 %1794  ;;  %v1521_v40 = vpop.permute.xlu0 %1520  ;;  %v1914_v15 = vpack.c.bf16 %v1577_v18, %v1573_v4  ;;  %v4311_v26 = vld [vmem:[%s4632_s6 + $0x38] ss:$0 sm:$0xff]  ;;  %v4773_v4 = vpack.c.bf16 %v4106_v46, %v4103_v19  ;;  %v4781_v46 = vld [vmem:[#allocation36_spill] sm:$0xff] }
 0x635   :  { %2009 = vmatprep.subr.bf16.mxu1 %v1918_v11  ;;  %v1523_v62 = vsel %vm218_vm9, %v4096_v54, %v1521_v40  ;;  %v1529_v60 = vsel %vm218_vm9, %v1521_v40, %v4756_v55  ;;  %v1814_v49 = vsel %vm481_vm2, %v1795_v29, %v4767_v33  ;;  %v4770_v54 = vpack.c.bf16 %v4066_v53, %v4063_v36  ;;  %v4780_v19 = vld [vmem:[#allocation34_spill] sm:$0xff] }
 0x636   :  { %v1534_v58 = vmul.f32 %v1529_v60, %v4768_v41  ;;  %v1537_v63 = vmul.f32 %v1523_v62, %v4769_v5  ;;  %1971 = vmatpush1.bf16.msra.mxu0 %v1911_v12  ;;  %v1533_v55 = vmul.f32 %v1522_v39, %v4769_v5  ;;  %v1940_v6 = vpack.c.bf16 %v1823_v57, %v1819_v17  ;;  %v4774_v12 = vld [vmem:[#allocation11_spill] sm:$0xff]  ;;  %v4776_v57 = vld [vmem:[#allocation26_spill] sm:$0xff]  ;;  %v4778_v62 = vld [vmem:[#allocation25_spill] sm:$0xff] }
 0x637   :  { %1972 = vmatprep.subr.bf16.mxu0 %v1908_v61  ;;  %v1818_v27 = vmul.f32 %v4289_v25, %v1814_v49  ;;  %v4775_v61 = vld [vmem:[#allocation17_spill] sm:$0xff]  ;;  %v4777_v39 = vmov 0   ;;  %v4779_v60 = vld [vmem:[#allocation35_spill] sm:$0xff]  ;;  %v4785_v17 = vld [vmem:[#allocation8_spill] sm:$0xff] }
 0x638   :  { %2010 = vmatpush1.bf16.msra.mxu1 %v4770_v54  ;;  %v1907_v30 = vpack.c.bf16 %v1534_v58, %v1530_v47  ;;  %v1807_v34 = vpop.permute.xlu1 %1806  ;;  %v1797_v38 = vpop.permute.xlu0 %1796  ;;  %v1910_v53 = vpack.c.bf16 %v1537_v63, %v1533_v55  ;;  %v4782_v47 = vld [vmem:[#allocation38_spill] sm:$0xff]  ;;  %v4783_v58 = vld [vmem:[#allocation44_spill] sm:$0xff]  ;;  %v4784_v63 = vld [vmem:[#allocation45_spill] sm:$0xff] }
 0x639   :  { %2011 = vmatprep.subr.bf16.mxu1 %v1914_v15  ;;  %v1815_v3 = vsel %vm481_vm2, %v1797_v38, %v4763_v43  ;;  %v1810_v21 = vsel %vm481_vm2, %v4094_v28, %v1807_v34  ;;  %v1816_v2 = vsel %vm481_vm2, %v1807_v34, %v1795_v29  ;;  %v4771_v43 = vpack.c.bf16 %v4086_v56, %v4083_v24  ;;  %v4317_v56 = vld [vmem:[%s4632_s6 + $0x40] ss:$0 sm:$0xff]  ;;  %v2265_v15 = vld [vmem:[%s4628_s2 + $0x30] sm:$0xf] }
 0x63a   :  { %v1822_v36 = vmul.f32 %v4289_v25, %v1815_v3  ;;  %1973 = vmatpush1.bf16.msra.mxu0 %v1907_v30  ;;  %v2713_v28 = vcombine.low %v4772_v44, %v4772_v44  ;;  %v1820_v24 = vmul.f32 %v4311_v26, %v1810_v21  ;;  %v4786_v49 = vld [vmem:[#allocation9_spill] sm:$0xff]  ;;  %v4787_v54 = vld [vmem:[#allocation30_spill] sm:$0xff]  ;;  %v4789_v30 = vld [vmem:[#allocation32_spill] sm:$0xff] }
 0x63b   :  { %1988 = vmatprep.subr.bf16.mxu0 %v1940_v6  ;;  %v4788_v55 = vld [vmem:[#allocation29_spill] sm:$0xff]  ;;  %v4793_v6 = vld [vmem:[#allocation47_spill] sm:$0xff] }
 0x63c   :  { %2012 = vmatpush1.bf16.msra.mxu1 %v4771_v43  ;;  %v1939_v9 = vpack.c.bf16 %v1822_v36, %v1818_v27  ;;  %v1809_v59 = vpop.permute.xlu0 %1808  ;;  %v4790_v34 = vld [vmem:[#allocation33_spill] sm:$0xff]  ;;  %v4794_v27 = vld [vmem:[#allocation46_spill] sm:$0xff] }
 0x63d   :  { %2013 = vmatprep.subr.bf16.mxu1 %v1910_v53  ;;  %v1811_v18 = vsel %vm481_vm2, %v4110_v0, %v1809_v59  ;;  %v1817_v11 = vsel %vm481_vm2, %v1809_v59, %v1797_v38  ;;  %v1821_v0 = vmul.f32 %v4317_v56, %v1816_v2  ;;  %v4791_v38 = vld [vmem:[#allocation39_spill] sm:$0xff]  ;;  %v4792_v3 = vld [vmem:[#allocation41_spill] sm:$0xff] }
 0x63e   :  { %v1824_v33 = vmul.f32 %v4311_v26, %v1811_v18  ;;  %v1825_v10 = vmul.f32 %v4317_v56, %v1817_v11  ;;  %1989 = vmatpush2.bf16.msra.mxu0 %v1939_v9 }
 0x63f   :  { %2717 = vmatprep.subr.msk.bf16.mxu0 %vm577_vm3, %v4774_v12 }
 0x640   :  { %2014 = vmatpush1.bf16.msra.mxu1 %v4773_v4  ;;  %v1941_v29 = vpack.c.bf16 %v1824_v33, %v1820_v24  ;;  %v1942_v40 = vpack.c.bf16 %v1825_v10, %v1821_v0 }
 0x641   :  { %1991 = vmatmul.mubr.bf16.vlgmr.msra.gmra.mxu0 %v2713_v28 }
 0x642   :  { %2029 = vmatprep.subr.bf16.mxu1 %v1942_v40  ;;  %2276 = vmatpush1.bf16.msra.mxu0 %v4775_v61  ;;  %v2467_v40 = vld [vmem:[%s4629_s3 + $0x38] sm:$0xf]  ;;  %v2448_v61 = vld [vmem:[%s4629_s3 + $0x30] sm:$0xff] }
 0x643   :  { %2277 = vmatprep.subr.bf16.mxu0 %v4776_v57  ;;  %2301 = vmatprep.mubr.bf16.mxu0 %v4777_v39 }
 0x644   :  { %2030 = vmatpush2.bf16.msra.mxu1 %v1941_v29 }
 0x645   :  { %v1947_v36 = vpop.permute.xlu1 %1946 }
 0x646   :  { %2278 = vmatpush1.bf16.msra.mxu0 %v4778_v62 }
 0x647   :  { %2032 = vmatmul.mubr.bf16.vlgmr.msra.gmra.mxu1 %v2713_v28  ;;  %2279 = vmatprep.subr.bf16.mxu0 %v4779_v60 }
 0x648   :  { %2398 = vmatprep.mubr.bf16.mxu1 %v4777_v39 }
 0x64a   :  { %2280 = vmatpush1.bf16.msra.mxu0 %v4780_v19 }
 0x64b   :  { %2281 = vmatprep.subr.bf16.mxu0 %v4781_v46 }
 0x64e   :  { %2282 = vmatpush1.bf16.msra.mxu0 %v4782_v47 }
 0x64f   :  { %2283 = vmatprep.subr.bf16.mxu0 %v4783_v58 }
 0x652   :  { %2284 = vmatpush1.bf16.msra.mxu0 %v4784_v63 }
 0x653   :  { %2719 = vmatprep.subr.msk.bf16.mxu0 %vm577_vm3, %v4785_v17 }
 0x655   :  { %2718 = vmatmul.mubr.msk.bf16.vlgmr.msra.gmra.mxu0 %vm573_vm11, %v2265_v15 }
 0x656   :  { %2317 = vmatpush1.bf16.msra.mxu0 %v4786_v49  ;;  %2342 = vmatprep.mubr.bf16.mxu0 %v4777_v39 }
 0x657   :  { %2318 = vmatprep.subr.bf16.mxu0 %v4787_v54 }
 0x65a   :  { %2319 = vmatpush1.bf16.msra.mxu0 %v4788_v55 }
 0x65b   :  { %2320 = vmatprep.subr.bf16.mxu0 %v4789_v30 }
 0x65e   :  { %2321 = vmatpush1.bf16.msra.mxu0 %v4790_v34 }
 0x65f   :  { %2322 = vmatprep.subr.bf16.mxu0 %v4791_v38 }
 0x662   :  { %2323 = vmatpush1.bf16.msra.mxu0 %v4792_v3 }
 0x663   :  { %2324 = vmatprep.subr.bf16.mxu0 %v4793_v6 }
 0x666   :  { %2325 = vmatpush1.bf16.msra.mxu0 %v4794_v27 }
 0x669   :  { %2720 = vmatmul.mubr.msk.bf16.vlgmr.msra.gmra.mxu0 %vm573_vm11, %v2265_v15 }
 0x66a   :  { %2439 = vmatprep.mubr.bf16.mxu0 %v4777_v39 }
 0x701   :  { %v1992_v53 = vpop.f32.mrf.mxu0 }
 0x702   :  { %v1993_v21 = vadd.f32 %v1992_v53, %v1947_v36 }
 0x703   :  { %v1994_v2 = vpop.f32.mrf.mxu0 }
 0x704   :  { %v4356_v43 = vmax.f32 %v1993_v21, 0.0  ;;  %v1995_v33 = vadd.f32 %v1994_v2, %v1947_v36 }
 0x705   :  { %v1996_v9 = vpop.f32.mrf.mxu0 }
 0x706   :  { %2148 = vrot.lane.b32.xlu1 %v4356_v43, %s2923_s25  ;;  %2188 = vrot.lane.b32.xlu0 %v4356_v43, %s2922_s24  ;;  %v4380_v10 = vmax.f32 %v1995_v33, 0.0 }
 0x707   :  { %v2033_v59 = vpop.f32.mrf.mxu1  ;;  %v1997_v18 = vpop.f32.mrf.mxu0 }
 0x708   :  { %v2034_v28 = vadd.f32 %v2033_v59, %v1947_v36 }
 0x709   :  { %v2035_v11 = vpop.f32.mrf.mxu1 }
 0x70a   :  { %2084 = vrot.lane.b32.xlu1 %v4356_v43, %s2926_s28  ;;  %2168 = vrot.lane.b32.xlu0 %v4356_v43, %s2925_s27  ;;  %v4370_v0 = vmax.f32 %v2034_v28, 0.0  ;;  %v2036_v4 = vadd.f32 %v2035_v11, %v1947_v36 }
 0x70b   :  { %v2037_v44 = vpop.f32.mrf.mxu1 }
 0x70c   :  { %v4398_v12 = vmax.f32 %v2036_v4, 0.0 }
 0x70d   :  { %v2038_v24 = vpop.f32.mrf.mxu1 }
 0x70e   :  { %2104 = vrot.lane.b32.xlu1 %v4356_v43, %s2927_s29  ;;  %2128 = vrot.lane.b32.xlu0 %v4356_v43, %s2924_s26 }
 0x712   :  { %2044 = vrot.lane.b32.xlu1 %v4356_v43, %s2928_s30  ;;  %2192 = vrot.lane.b32.xlu0 %v4370_v0, %s2922_s24 }
 0x715   :  { %v4424_v29 = vpop.f32.mrf.mxu0 }
 0x716   :  { %2064 = vrot.lane.b32.xlu1 %v4356_v43, %s2929_s8  ;;  %2152 = vrot.lane.b32.xlu0 %v4370_v0, %s2923_s25 }
 0x717   :  { %v4436_v57 = vpop.f32.mrf.mxu0 }
 0x719   :  { %v2307_v62 = vpop.f32.mrf.mxu0 }
 0x71a   :  { %2190 = vrot.lane.b32.xlu1 %v4380_v10, %s2922_s24  ;;  %2172 = vrot.lane.b32.xlu0 %v4370_v0, %s2925_s27  ;;  %v4795_v62 = vld [vmem:[#allocation13_spill] sm:$0xff] }
 0x71b   :  { %v2308_v60 = vpop.f32.mrf.mxu0 }
 0x71e   :  { %2150 = vrot.lane.b32.xlu1 %v4380_v10, %s2923_s25  ;;  %2132 = vrot.lane.b32.xlu0 %v4370_v0, %s2924_s26 }
 0x722   :  { %2170 = vrot.lane.b32.xlu1 %v4380_v10, %s2925_s27  ;;  %2086 = vrot.lane.b32.xlu0 %v4380_v10, %s2926_s28 }
 0x726   :  { %2130 = vrot.lane.b32.xlu1 %v4380_v10, %s2924_s26  ;;  %2106 = vrot.lane.b32.xlu0 %v4380_v10, %s2927_s29 }
 0x729   :  { %v4438_v19 = vpop.f32.mrf.mxu0 }
 0x72a   :  { %2194 = vrot.lane.b32.xlu1 %v4398_v12, %s2922_s24  ;;  %2046 = vrot.lane.b32.xlu0 %v4380_v10, %s2928_s30 }
 0x72b   :  { %v4440_v46 = vpop.f32.mrf.mxu0 }
 0x72d   :  { %v2348_v47 = vpop.f32.mrf.mxu0 }
 0x72e   :  { %2154 = vrot.lane.b32.xlu1 %v4398_v12, %s2923_s25  ;;  %2066 = vrot.lane.b32.xlu0 %v4380_v10, %s2929_s8  ;;  %v4796_v47 = vld [vmem:[#allocation14_spill] sm:$0xff] }
 0x72f   :  { %v2349_v58 = vpop.f32.mrf.mxu0 }
 0x732   :  { %2090 = vrot.lane.b32.xlu1 %v4398_v12, %s2926_s28  ;;  %2174 = vrot.lane.b32.xlu0 %v4398_v12, %s2925_s27 }
 0x736   :  { %2134 = vrot.lane.b32.xlu1 %v4398_v12, %s2924_s26  ;;  %2110 = vrot.lane.b32.xlu0 %v4398_v12, %s2927_s29 }
 0x73a   :  { %2070 = vrot.lane.b32.xlu1 %v4398_v12, %s2929_s8  ;;  %2050 = vrot.lane.b32.xlu0 %v4398_v12, %s2928_s30 }
 0x73e   :  { %2108 = vrot.lane.b32.xlu1 %v4370_v0, %s2927_s29  ;;  %2088 = vrot.lane.b32.xlu0 %v4370_v0, %s2926_s28 }
 0x742   :  { %2068 = vrot.lane.b32.xlu1 %v4370_v0, %s2929_s8  ;;  %2048 = vrot.lane.b32.xlu0 %v4370_v0, %s2928_s30 }
 0x746   :  { %2470 = vperm.xlu1 %2790, %v2467_v40   ;;  %2451 = vperm.xlu0 %2789, %v2448_v61  }
 0x778   :  { %v4442_v63 = vpop.permute.xlu1 %2148  ;;  %v2189_v15 = vpop.permute.xlu0 %2188 }
 0x77c   :  { %v4444_v17 = vpop.permute.xlu1 %2084  ;;  %v4446_v49 = vpop.permute.xlu0 %2168 }
 0x780   :  { %v4448_v54 = vpop.permute.xlu1 %2104  ;;  %v4450_v55 = vpop.permute.xlu0 %2128 }
 0x784   :  { %v4452_v30 = vpop.permute.xlu1 %2044  ;;  %v2193_v34 = vpop.permute.xlu0 %2192 }
 0x788   :  { %v4454_v38 = vpop.permute.xlu1 %2064  ;;  %v2153_v3 = vpop.permute.xlu0 %2152 }
 0x78c   :  { %v2191_v6 = vpop.permute.xlu1 %2190  ;;  %v2173_v27 = vpop.permute.xlu0 %2172 }
 0x78d   :  { %v2197_v36 = vsel %vm481_vm2, %v2191_v6, %v2193_v34  ;;  %v2198_v53 = vsel %vm481_vm2, %v2189_v15, %v2191_v6 }
 0x78e   :  { %v2200_v21 = vmul.f32 %v4289_v25, %v2198_v53  ;;  %v2201_v2 = vmul.f32 %v4260_v32, %v2197_v36 }
 0x790   :  { %v2261_v9 = vpack.c.bf16 %v2200_v21, %v2200_v21  ;;  %v2262_v59 = vpack.c.bf16 %v2201_v2, %v2201_v2  ;;  %v2151_v18 = vpop.permute.xlu1 %2150  ;;  %v4462_v11 = vpop.permute.xlu0 %2132 }
 0x791   :  { %v2157_v28 = vsel %vm407_vm6, %v2151_v18, %v2153_v3  ;;  %v2158_v24 = vsel %vm407_vm6, %v4442_v63, %v2151_v18 }
 0x792   :  { %2721 = vmatprep.subr.msk.bf16.mxu1 %vm577_vm3, %v2262_v59  ;;  %v2355_v44 = vsel %vm577_vm3, %v2261_v9, 0  ;;  %v2160_v40 = vmul.f32 %v2158_v24, %v3209_v23  ;;  %v2161_v61 = vmul.f32 %v2157_v28, %v4748_v37  ;;  %v4797_v59 = vld [vmem:[#allocation20_spill] sm:$0xff]  ;;  %v4799_v24 = vld [vmem:[#allocation15_spill] sm:$0xff] }
 0x793   :  { %2373 = vmatpush1.bf16.msra.mxu1 %v2355_v44  ;;  %v4798_v44 = vld [vmem:[#allocation21_spill] sm:$0xff] }
 0x794   :  { %v2171_v25 = vpop.permute.xlu1 %2170  ;;  %v4471_v33 = vpop.permute.xlu0 %2086 }
 0x795   :  { %v2177_v32 = vsel %vm444_vm4, %v2171_v25, %v2173_v27  ;;  %v2178_v4 = vsel %vm444_vm4, %v4446_v49, %v2171_v25  ;;  %v2094_v2 = vsel %vm292_vm7, %v4444_v17, %v4471_v33 }
 0x796   :  { %v2180_v60 = vmul.f32 %v2178_v4, %v4795_v62  ;;  %v2181_v58 = vmul.f32 %v2177_v32, %v4796_v47  ;;  %v2097_v32 = vmul.f32 %v2094_v2, %v3222_v31 }
 0x798   :  { %v2257_v6 = vpack.c.bf16 %v2180_v60, %v2160_v40  ;;  %v2131_v36 = vpop.permute.xlu1 %2130  ;;  %v4482_v53 = vpop.permute.xlu0 %2106  ;;  %v2258_v21 = vpack.c.bf16 %v2181_v58, %v2161_v61 }
 0x799   :  { %v2137_v23 = vsel %vm370_vm5, %v2131_v36, %v4462_v11  ;;  %v2138_v37 = vsel %vm370_vm5, %v4450_v55, %v2131_v36  ;;  %v2114_v9 = vsel %vm329_vm8, %v4448_v54, %v4482_v53 }
 0x79a   :  { %v2140_v18 = vmul.f32 %v2138_v37, %v4797_v59  ;;  %v2141_v28 = vmul.f32 %v2137_v23, %v4798_v44  ;;  %v2117_v25 = vmul.f32 %v2114_v9, %v4799_v24  ;;  %2374 = vmatprep.subr.bf16.mxu1 %v2258_v21 }
 0x79b   :  { %2375 = vmatpush1.bf16.msra.mxu1 %v2257_v6 }
 0x79c   :  { %v2253_v4 = vpack.c.bf16 %v2140_v18, %v4356_v43  ;;  %v2195_v40 = vpop.permute.xlu1 %2194  ;;  %v4503_v61 = vpop.permute.xlu0 %2046  ;;  %v2254_v62 = vpack.c.bf16 %v2141_v28, %v4380_v10  ;;  %v2250_v6 = vpack.c.bf16 %v2117_v25, %v2097_v32 }
 0x79d   :  { %v2196_v60 = vsel %vm481_vm2, %v2193_v34, %v2195_v40  ;;  %v2199_v47 = vsel %vm481_vm2, %v2195_v40, %v2189_v15 }
 0x79e   :  { %v2202_v58 = vmul.f32 %v4311_v26, %v2196_v60  ;;  %v2203_v36 = vmul.f32 %v4317_v56, %v2199_v47  ;;  %2376 = vmatprep.subr.bf16.mxu1 %v2254_v62 }
 0x79f   :  { %2377 = vmatpush1.bf16.msra.mxu1 %v2253_v4 }
 0x7a0   :  { %v2263_v31 = vpack.c.bf16 %v2202_v58, %v2202_v58  ;;  %v2264_v43 = vpack.c.bf16 %v2203_v36, %v2203_v36  ;;  %v2155_v21 = vpop.permute.xlu1 %2154  ;;  %2378 = vmatprep.subr.bf16.mxu1 %v2250_v6  ;;  %v4512_v2 = vpop.permute.xlu0 %2066 }
 0x7a1   :  { %v2156_v15 = vsel %vm407_vm6, %v2153_v3, %v2155_v21  ;;  %v2159_v26 = vsel %vm407_vm6, %v2155_v21, %v4442_v63  ;;  %v2074_v23 = vsel %vm255_vm10, %v4454_v38, %v4512_v2 }
 0x7a2   :  { %2723 = vmatprep.subr.msk.bf16.mxu0 %vm577_vm3, %v2264_v43  ;;  %v2361_v10 = vsel %vm577_vm3, %v2263_v31, 0  ;;  %v2162_v3 = vmul.f32 %v2156_v15, %v3252_v51  ;;  %v2163_v59 = vmul.f32 %v2159_v26, %v3256_v52  ;;  %v2077_v51 = vmul.f32 %v2074_v23, %v4754_v7  ;;  %v4801_v31 = vld [vmem:[#allocation12_spill] sm:$0xff]  ;;  %v4802_v23 = vld [vmem:[#allocation42_spill] sm:$0xff] }
 0x7a3   :  { %2414 = vmatpush1.bf16.msra.mxu0 %v2361_v10 }
 0x7a4   :  { %v2091_v56 = vpop.permute.xlu1 %2090  ;;  %v2175_v34 = vpop.permute.xlu0 %2174 }
 0x7a5   :  { %v2176_v37 = vsel %vm444_vm4, %v2173_v27, %v2175_v34  ;;  %v2179_v9 = vsel %vm444_vm4, %v2175_v34, %v4446_v49  ;;  %v2095_v44 = vsel %vm292_vm7, %v2091_v56, %v4444_v17  ;;  %v2054_v27 = vsel %vm218_vm9, %v4452_v30, %v4503_v61 }
 0x7a6   :  { %v2182_v63 = vmul.f32 %v2176_v37, %v3171_v8  ;;  %v2183_v18 = vmul.f32 %v2179_v9, %v3188_v14  ;;  %v2096_v17 = vmul.f32 %v2095_v44, %v4757_v16  ;;  %v2057_v40 = vmul.f32 %v2054_v27, %v4759_v1 }
 0x7a8   :  { %v2259_v28 = vpack.c.bf16 %v2182_v63, %v2162_v3  ;;  %v2135_v24 = vpop.permute.xlu1 %2134  ;;  %v2111_v49 = vpop.permute.xlu0 %2110  ;;  %v2260_v25 = vpack.c.bf16 %v2183_v18, %v2163_v59  ;;  %v4803_v3 = vld [vmem:[#allocation37_spill] sm:$0xff] }
 0x7a9   :  { %v2136_v8 = vsel %vm370_vm5, %v4462_v11, %v2135_v24  ;;  %v2139_v14 = vsel %vm370_vm5, %v2135_v24, %v4450_v55  ;;  %v2115_v52 = vsel %vm329_vm8, %v2111_v49, %v4448_v54 }
 0x7aa   :  { %v2142_v32 = vmul.f32 %v2136_v8, %v3197_v20  ;;  %v2143_v4 = vmul.f32 %v2139_v14, %v3204_v22  ;;  %v2116_v7 = vmul.f32 %v2115_v52, %v4750_v42  ;;  %2415 = vmatprep.subr.bf16.mxu0 %v2260_v25  ;;  %v2246_v22 = vpack.c.bf16 %v2077_v51, %v2057_v40 }
 0x7ab   :  { %2416 = vmatpush1.bf16.msra.mxu0 %v2259_v28 }
 0x7ac   :  { %v2255_v11 = vpack.c.bf16 %v2142_v32, %v4370_v0  ;;  %v2249_v62 = vpack.c.bf16 %v2116_v7, %v2096_v17  ;;  %v2071_v55 = vpop.permute.xlu1 %2070  ;;  %v2051_v60 = vpop.permute.xlu0 %2050  ;;  %v2256_v47 = vpack.c.bf16 %v2143_v4, %v4398_v12 }
 0x7ad   :  { %v2075_v16 = vsel %vm255_vm10, %v2071_v55, %v4454_v38  ;;  %v2055_v20 = vsel %vm218_vm9, %v2051_v60, %v4452_v30 }
 0x7ae   :  { %v2076_v42 = vmul.f32 %v2075_v16, %v4764_v35  ;;  %v2056_v1 = vmul.f32 %v2055_v20, %v4768_v41  ;;  %2379 = vmatpush1.bf16.msra.mxu1 %v2249_v62  ;;  %2417 = vmatprep.subr.bf16.mxu0 %v2256_v47  ;;  %v4800_v41 = vld [vmem:[#allocation16_spill] sm:$0xff] }
 0x7af   :  { %2380 = vmatprep.subr.bf16.mxu1 %v2246_v22  ;;  %2418 = vmatpush1.bf16.msra.mxu0 %v2255_v11  ;;  %v2571_v16 = vld [vmem:[%s4627_s1] sm:$0xff] }
 0x7b0   :  { %v2245_v0 = vpack.c.bf16 %v2076_v42, %v2056_v1  ;;  %v2109_v54 = vpop.permute.xlu1 %2108  ;;  %v2089_v12 = vpop.permute.xlu0 %2088  ;;  %v2575_v42 = vcombine.high %v2571_v16, %v2571_v16 }
 0x7b1   :  { %v2112_v58 = vsel %vm329_vm8, %v2109_v54, %v2111_v49  ;;  %v2113_v38 = vsel %vm329_vm8, %v4482_v53, %v2109_v54  ;;  %v2092_v30 = vsel %vm292_vm7, %v2089_v12, %v2091_v56  ;;  %v2093_v35 = vsel %vm292_vm7, %v4471_v33, %v2089_v12  ;;  %v2208_v53 = vld [vmem:[%s4628_s2 + $0x20] sm:$0xf] }
 0x7b2   :  { %v2118_v36 = vmul.f32 %v2113_v38, %v4800_v41  ;;  %v2119_v6 = vmul.f32 %v2112_v58, %v4751_v45  ;;  %v2098_v43 = vmul.f32 %v2093_v35, %v4801_v31  ;;  %v2099_v21 = vmul.f32 %v2092_v30, %v4758_v50  ;;  %2381 = vmatpush1.bf16.msra.mxu1 %v2245_v0  ;;  %v2572_v30 = vld [vmem:[%s4627_s1 + $0x8] sm:$0xff]  ;;  %s2936_s1 = smov [#allocation5]  }
 0x7b3   :  { %v2576_v31 = vcombine.high %v2572_v30, %v2572_v30  ;;  %s2612_s9 = sshll.u32 %s2936_s1, 4  ;;  %s2613_s9 = int_to_ptr.vmem [resolvable:$true] %s2612_s9 }
 0x7b4   :  { %v2251_v10 = vpack.c.bf16 %v2118_v36, %v2098_v43  ;;  %v2069_v15 = vpop.permute.xlu1 %2068  ;;  %v2049_v26 = vpop.permute.xlu0 %2048  ;;  %v2252_v56 = vpack.c.bf16 %v2119_v6, %v2099_v21  ;;  %s2899_s10 = scalar_lea.vmem %s2613_s9, 16  ;;  %s2903_s11 = scalar_lea.vmem %s2613_s9, 32 }
 0x7b5   :  { %v2072_v33 = vsel %vm255_vm10, %v2069_v15, %v2071_v55  ;;  %v2073_v45 = vsel %vm255_vm10, %v4512_v2, %v2069_v15  ;;  %v2052_v34 = vsel %vm218_vm9, %v2049_v26, %v2051_v60  ;;  %v2053_v50 = vsel %vm218_vm9, %v4503_v61, %v2049_v26  ;;  %2722 = vmatmul.mubr.msk.bf16.vlgmr.msra.gmra.mxu1 %vm573_vm11, %v2208_v53  ;;  %p2900_p0 = scmp.ne.s32.totalorder %s2613_s9, %s2899_s10  ;;  %p2904_p1 = scmp.lt.s32.totalorder %s2613_s9, %s2613_s9 }
 0x7b6   :  { %v2078_v37 = vmul.f32 %v2073_v45, %v4802_v23  ;;  %v2079_v9 = vmul.f32 %v2072_v33, %v4765_v13  ;;  %v2058_v59 = vmul.f32 %v2053_v50, %v4803_v3  ;;  %v2059_v63 = vmul.f32 %v2052_v34, %v4769_v5  ;;  %2419 = vmatprep.subr.bf16.mxu0 %v2252_v56  ;;  %p2905_p2 = scmp.lt.s32.totalorder %s2903_s11, %s2899_s10 }
 0x7b7   :  { %2420 = vmatpush1.bf16.msra.mxu0 %v2251_v10  ;;  %2521 = vmatprep.mubr.bf16.mxu1 %v4777_v39 }
 0x7b8   :  { %v2247_v2 = vpack.c.bf16 %v2078_v37, %v2058_v59  ;;  %v2248_v18 = vpack.c.bf16 %v2079_v9, %v2059_v63  ;;  %p2906_p3 = por %p2905_p2, %p2904_p1 }
 0x7ba   :  { %2421 = vmatprep.subr.bf16.mxu0 %v2248_v18  ;;  %p2907_p4 = pnand %p2906_p3, %p2900_p0 }
 0x7bb   :  { %2422 = vmatpush1.bf16.msra.mxu0 %v2247_v2 }
 0x7be   :  { %2724 = vmatmul.mubr.msk.bf16.vlgmr.msra.gmra.mxu0 %vm573_vm11, %v2208_v53 }
 0x7c1   :  { %v2452_v44 = vpop.permute.xlu0 %2451  ;;  %v2471_v22 = vpop.permute.xlu1 %2470 }
 0x875   :  { %v2400_v48 = vpop.f32.mrf.mxu1 }
 0x876   :  { %v2401_v61 = vadd.f32 %v2400_v48, %v4424_v29 }
 0x877   :  { %v2402_v27 = vpop.f32.mrf.mxu1 }
 0x878   :  { %v2454_v13 = vadd.f32 %v2452_v44, %v2401_v61  ;;  %v2403_v28 = vadd.f32 %v2402_v27, %v4436_v57  ;;  %v2462_v57 = vld [vmem:[%s4628_s2 + $0x60] sm:$0x3] }
 0x879   :  { %v2404_v24 = vpop.f32.mrf.mxu1 }
 0x87a   :  { %v2458_v5 = vmax.f32 %v2454_v13, 0.0  ;;  %v2455_v49 = vadd.f32 %v2452_v44, %v2403_v28 }
 0x87b   :  { %v2405_v25 = vpop.f32.mrf.mxu1 }
 0x87c   :  { %v2463_v51 = vpack.c.bf16 %v2458_v5, %v2458_v5  ;;  %v2459_v8 = vmax.f32 %v2455_v49, 0.0 }
 0x87e   :  { %v2464_v14 = vpack.c.bf16 %v2459_v8, %v2459_v8  ;;  %v2441_v52 = vpop.f32.mrf.mxu0  ;;  %v2478_v29 = vsel %vm577_vm3, %v2463_v51, 0 }
 0x87f   :  { %v2442_v17 = vadd.f32 %v2441_v52, %v4438_v19 }
 0x880   :  { %v2443_v32 = vpop.f32.mrf.mxu0  ;;  %2725 = vmatprep.subr.msk.bf16.mxu1 %vm577_vm3, %v2464_v14 }
 0x881   :  { %v2456_v4 = vadd.f32 %v2452_v44, %v2442_v17  ;;  %v2444_v7 = vadd.f32 %v2443_v32, %v4440_v46  ;;  %2504 = vmatpush1.bf16.msra.mxu1 %v2478_v29 }
 0x882   :  { %v2445_v40 = vpop.f32.mrf.mxu0 }
 0x883   :  { %v2460_v11 = vmax.f32 %v2456_v4, 0.0  ;;  %v2457_v62 = vadd.f32 %v2452_v44, %v2444_v7 }
 0x884   :  { %v2446_v55 = vpop.f32.mrf.mxu0  ;;  %2726 = vmatmul.mubr.msk.bf16.vlgmr.msra.gmra.mxu1 %vm2473_vm13, %v2462_v57 }
 0x885   :  { %v2465_v19 = vpack.c.bf16 %v2460_v11, %v2460_v11  ;;  %v2461_v60 = vmax.f32 %v2457_v62, 0.0  ;;  %2562 = vmatprep.mubr.bf16.mxu1 %v4777_v39 }
 0x887   :  { %v2466_v47 = vpack.c.bf16 %v2461_v60, %v2461_v60  ;;  %v2484_v46 = vsel %vm577_vm3, %v2465_v19, 0 }
 0x889   :  { %2727 = vmatprep.subr.msk.bf16.mxu1 %vm577_vm3, %v2466_v47 }
 0x88a   :  { %2545 = vmatpush1.bf16.msra.mxu1 %v2484_v46 }
 0x88d   :  { %2728 = vmatmul.mubr.msk.bf16.vlgmr.msra.gmra.mxu1 %vm2473_vm13, %v2462_v57 }
 0x944   :  { %v2523_v20 = vpop.f32.mrf.mxu1 }
 0x945   :  { %v2524_v1 = vadd.f32 %v2523_v20, %v2471_v22 }
 0x946   :  { %v2525_v0 = vpop.f32.mrf.mxu1 }
 0x947   :  { %v2526_v54 = vadd.f32 %v2525_v0, %v2471_v22  ;;  %v2579_v39 = vsub.f32 %v2524_v1, %v2571_v16 }
 0x948   :  { %v2527_v12 = vpop.f32.mrf.mxu1 }
 0x949   :  { %v2580_v58 = vsub.f32 %v2526_v54, %v2575_v42  ;;  %v2583_v36 = vmul.f32 %v2579_v39, %v2579_v39 }
 0x94a   :  { %v2528_v38 = vpop.f32.mrf.mxu1 }
 0x94b   :  { %v2584_v35 = vmul.f32 %v2580_v58, %v2580_v58  ;;  %v2587_v26 = vsel %vm577_vm3, %v2583_v36, 0.0 }
 0x94d   :  { %v2564_v41 = vpop.f32.mrf.mxu1  ;;  %v2588_v21 = vsel %vm577_vm3, %v2584_v35, 0.0 }
 0x94e   :  { %v2565_v6 = vadd.f32 %v2564_v41, %v2471_v22  ;;  %v2589_v45 = vadd.f32 %v2588_v21, %v2587_v26 }
 0x94f   :  { %v2566_v43 = vpop.f32.mrf.mxu1 }
 0x950   :  { %v2581_v53 = vsub.f32 %v2565_v6, %v2572_v30  ;;  %v2567_v10 = vadd.f32 %v2566_v43, %v2471_v22 }
 0x951   :  { %v2568_v15 = vpop.f32.mrf.mxu1 }
 0x952   :  { %v2585_v56 = vmul.f32 %v2581_v53, %v2581_v53  ;;  %v2582_v33 = vsub.f32 %v2567_v10, %v2576_v31 }
 0x953   :  { %v2569_v34 = vpop.f32.mrf.mxu1 }
 0x954   :  { %v2590_v50 = vsel %vm577_vm3, %v2585_v56, 0.0  ;;  %v2586_v23 = vmul.f32 %v2582_v33, %v2582_v33 }
 0x955   :  { %v2591_v37 = vadd.f32 %v2590_v50, %v2589_v45 }
 0x956   :  { %v2592_v9 = vsel %vm577_vm3, %v2586_v23, 0.0 }
 0x957   :  { %v2593_v3 = vadd.f32 %v2592_v9, %v2591_v37 }
 0x959   :  { %2594 = vadd.xlane.f32.xlu0 %v2593_v3 }
 0x9e2   :  { %v2595_v59 = vpop.xlane.xlu0 %2594 }
 0x9e3   :  { %v2596_v63 = vsel %vm577_vm3, %v2595_v59, 0.0 }
 0x9e4   :  { %v2597_v2 = vrot.slane %v2596_v63, 4 }
 0x9e6   :  { %v2598_v18 = vadd.f32 %v2597_v2, %v2596_v63 }
 0x9e8   :  { %v2599_v48 = vrot.slane %v2598_v18, 2 }
 0x9ea   :  { %v2600_v61 = vadd.f32 %v2599_v48, %v2598_v18 }
 0x9ec   :  { %v2601_v44 = vrot.slane %v2600_v61, 1 }
 0x9ee   :  { %v2602_v27 = vadd.f32 %v2601_v44, %v2600_v61 }
 0x9f0   :  { %v2603_v13 = vmul.f32 0.00048828125, %v2602_v27 }
 0x9f2   :  { %2605 = vst.msk [vmem:[#allocation5] sm:$0x1] %vm2604_vm14, %v2603_v13 }
 0x9f3   :  { %2910 = shalt.err (!%p2907_p4)
}
 0x9f4   :  { %2615 = dma.vmem_to_hbm [thread:$0]  %s2613_s9, 16, %s4633_s7, [#allocation6]  }
 0x9f5   :  { %2919 = dma.done.wait [#allocation6], 16  }
 0x9f6   :  { %2920 = vsyncadd [#allocation6], 4294967280 }
 0x9f7   :  { %2619 = vsyncpa [#allocation6], 1 }

</bundles_post_ra>
